<compile_context>
chip_gen: v7x
topology: tpu7x:2x2x1
jax: 0.10.0
libtpu: 0.0.40
codegen_flags: <defaults>
</compile_context>

<pallas_src>
import math

import jax
import jax.numpy as jnp
import numpy as np
from jax import lax
from jax.experimental import pallas as pl
from jax.experimental.pallas import tpu as pltpu

D_MODEL = 256
N_HEAD = 2
HEAD_DIM = D_MODEL // N_HEAD
D_FF = 256
N_LAYERS = 2
LN_EPS = 1e-5

# ---- packed big-weight slab layout (bf16), all offsets 128-aligned ----
_W_QKV = 0                        # (D_MODEL, 3*D_MODEL)   in_proj_weight.T
_W_OUT = 3 * D_MODEL              # (D_MODEL, D_MODEL)     out_proj.weight.T
_W_FF1 = 4 * D_MODEL              # (D_MODEL, D_FF)        linear1.weight.T
_W_FF2 = 4 * D_MODEL + D_FF       # (D_FF, D_MODEL)        linear2.weight.T
W_SLAB = _W_FF2 + D_MODEL         # = 1536

# ---- packed small-param slab layout (f32), all offsets 128-aligned ----
_P_BIN = 0                        # (3*D_MODEL,)  in_proj_bias
_P_BOUT = 3 * D_MODEL             # out_proj.bias
_P_LN1W = 4 * D_MODEL
_P_LN1B = 5 * D_MODEL
_P_B1 = 6 * D_MODEL
_P_B2 = 7 * D_MODEL
_P_LN2W = 8 * D_MODEL
_P_LN2B = 9 * D_MODEL
P_SLAB = 10 * D_MODEL             # = 2560


def _layer_norm(x, w, b):
    mu = jnp.mean(x, axis=-1, keepdims=True)
    var = jnp.mean(jnp.square(x - mu), axis=-1, keepdims=True)
    return (x - mu) * lax.rsqrt(var + LN_EPS) * w + b


def social_transformer_kernel(h_ref, mask_ref, wenc_ref, w_ref, p_ref,
                              out_ref, x_sc, x0_sc):
    layer = pl.program_id(0)

    # ---- step 0: encode_past -> f32 activations resident in VMEM scratch ----
    @pl.when(layer == 0)
    def _():
        x0 = jnp.dot(h_ref[...].astype(jnp.bfloat16), wenc_ref[...],
                     preferred_element_type=jnp.float32)
        x0_sc[...] = x0
        x_sc[...] = x0

    x = x_sc[...]
    mask = mask_ref[...]
    scale = 1.0 / math.sqrt(HEAD_DIM)

    # per-layer weight / bias slices (static, lane-aligned)
    w_in = w_ref[0, :, _W_QKV:_W_QKV + 3 * D_MODEL]          # (256, 768) bf16
    w1 = w_ref[0, :, _W_FF1:_W_FF1 + D_FF]                   # (256, 256) bf16
    w2 = w_ref[0, :, _W_FF2:_W_FF2 + D_MODEL]                # (256, 256) bf16

    b_in = p_ref[0, :, _P_BIN:_P_BIN + 3 * D_MODEL]          # (1, 768) f32
    b_out = p_ref[0, :, _P_BOUT:_P_BOUT + D_MODEL]
    ln1_w = p_ref[0, :, _P_LN1W:_P_LN1W + D_MODEL]
    ln1_b = p_ref[0, :, _P_LN1B:_P_LN1B + D_MODEL]
    b1 = p_ref[0, :, _P_B1:_P_B1 + D_FF]
    b2 = p_ref[0, :, _P_B2:_P_B2 + D_MODEL]
    ln2_w = p_ref[0, :, _P_LN2W:_P_LN2W + D_MODEL]
    ln2_b = p_ref[0, :, _P_LN2B:_P_LN2B + D_MODEL]

    # ---- multi-head self-attention (post-norm block) ----
    qkv = jnp.dot(x.astype(jnp.bfloat16), w_in,
                  preferred_element_type=jnp.float32) + b_in          # (B, 768) f32
    attn = None
    for hh in range(N_HEAD):
        qh = qkv[:, hh * HEAD_DIM:(hh + 1) * HEAD_DIM]
        kh = qkv[:, D_MODEL + hh * HEAD_DIM:D_MODEL + (hh + 1) * HEAD_DIM]
        vh = qkv[:, 2 * D_MODEL + hh * HEAD_DIM:2 * D_MODEL + (hh + 1) * HEAD_DIM]
        # contract the last axes of q and k directly (no materialized k.T)
        s = lax.dot_general(qh, kh, (((1,), (1,)), ((), ())),
                            preferred_element_type=jnp.float32) * scale + mask
        s = s - jnp.max(s, axis=-1, keepdims=True)
        e = jnp.exp(s)
        p = e * pl.reciprocal(jnp.sum(e, axis=-1, keepdims=True), approx=True)
        head = jnp.dot(p, vh, preferred_element_type=jnp.float32)     # (B, 128)
        # accumulate output projection per head (no lane-dim concatenate)
        w_out_h = w_ref[0, hh * HEAD_DIM:(hh + 1) * HEAD_DIM,
                        _W_OUT:_W_OUT + D_MODEL]                       # (128, 256) bf16
        contrib = jnp.dot(head.astype(jnp.bfloat16), w_out_h,
                          preferred_element_type=jnp.float32)
        attn = contrib if attn is None else attn + contrib
    attn = attn + b_out
    x = _layer_norm(x + attn, ln1_w, ln1_b)

    # ---- feed-forward (relu) ----
    ff = jnp.dot(x.astype(jnp.bfloat16), w1,
                 preferred_element_type=jnp.float32) + b1
    ff = jnp.maximum(ff, 0.0)
    ff = jnp.dot(ff.astype(jnp.bfloat16), w2,
                 preferred_element_type=jnp.float32) + b2
    x = _layer_norm(x + ff, ln2_w, ln2_b)

    x_sc[...] = x

    # ---- final residual from the module's forward: h_feat + h_feat_ ----
    @pl.when(layer == N_LAYERS - 1)
    def _():
        out_ref[...] = x0_sc[...] + x_sc[...]


def social_transformer_forward(h, mask, params):
    """h: (B, t_h, d_h) float32, mask: (B, B) additive float attention mask."""
    B = h.shape[0]
    in_feat = h.shape[1] * h.shape[2]
    h_flat = h.reshape(B, in_feat).astype(jnp.float32)
    mask = mask.astype(jnp.float32)

    w_enc = params["w_enc"]                                            # (in_feat, 256) bf16
    w_slab = jnp.concatenate(
        [params["w_in"], params["w_out"], params["w1"], params["w2"]],
        axis=-1)                                                       # (L, 256, 1536) bf16
    p_slab = jnp.concatenate(
        [params["b_in"], params["b_out"], params["ln1_w"], params["ln1_b"],
         params["b1"], params["b2"], params["ln2_w"], params["ln2_b"]],
        axis=-1)                                                       # (L, 1, 2560) f32

    grid_spec = pltpu.PrefetchScalarGridSpec(
        num_scalar_prefetch=0,
        grid=(N_LAYERS,),
        in_specs=[
            pl.BlockSpec((B, in_feat), lambda l: (0, 0)),              # h (constant block)
            pl.BlockSpec((B, B), lambda l: (0, 0)),                    # mask
            pl.BlockSpec((in_feat, D_MODEL), lambda l: (0, 0)),        # w_enc
            pl.BlockSpec((1, D_MODEL, W_SLAB), lambda l: (l, 0, 0)),   # per-layer weight slab
            pl.BlockSpec((1, 1, P_SLAB), lambda l: (l, 0, 0)),         # per-layer bias/LN slab
        ],
        out_specs=pl.BlockSpec((B, D_MODEL), lambda l: (0, 0)),
        scratch_shapes=[pltpu.VMEM((B, D_MODEL), jnp.float32),         # x carry
                        pltpu.VMEM((B, D_MODEL), jnp.float32)],        # x0 (encode_past)
    )

    out = pl.pallas_call(
        social_transformer_kernel,
        out_shape=jax.ShapeDtypeStruct((B, D_MODEL), jnp.float32),
        grid_spec=grid_spec,
        compiler_params=pltpu.CompilerParams(
            dimension_semantics=("arbitrary",)),
    )(h_flat, mask, w_enc, w_slab, p_slab)
    return out[:, None, :]  # (B, 1, 256) to match the torch module's output shape


def init_params(key, t_h, d_h):
    in_feat = t_h * d_h
    ks = jax.random.split(key, 9)

    def rnd(k, shape, scale=0.02):
        return jax.random.normal(k, shape, jnp.float32) * scale

    # big matmul weights stored pre-transposed (x @ W) and in bf16; small params stay f32
    return dict(
        w_enc=rnd(ks[0], (in_feat, D_MODEL)).astype(jnp.bfloat16),
        w_in=rnd(ks[1], (N_LAYERS, D_MODEL, 3 * D_MODEL)).astype(jnp.bfloat16),
        w_out=rnd(ks[3], (N_LAYERS, D_MODEL, D_MODEL)).astype(jnp.bfloat16),
        w1=rnd(ks[5], (N_LAYERS, D_MODEL, D_FF)).astype(jnp.bfloat16),
        w2=rnd(ks[7], (N_LAYERS, D_FF, D_MODEL)).astype(jnp.bfloat16),
        b_in=rnd(ks[2], (N_LAYERS, 1, 3 * D_MODEL)),
        b_out=rnd(ks[4], (N_LAYERS, 1, D_MODEL)),
        b1=rnd(ks[6], (N_LAYERS, 1, D_FF)),
        b2=rnd(ks[8], (N_LAYERS, 1, D_MODEL)),
        ln1_w=jnp.ones((N_LAYERS, 1, D_MODEL), jnp.float32),
        ln1_b=jnp.zeros((N_LAYERS, 1, D_MODEL), jnp.float32),
        ln2_w=jnp.ones((N_LAYERS, 1, D_MODEL), jnp.float32),
        ln2_b=jnp.zeros((N_LAYERS, 1, D_MODEL), jnp.float32),
    )


def reference_forward(h, mask, params):
    """Pure-JAX reference mirroring nn.TransformerEncoder(post-norm) semantics
    (same bf16-weight / f32-accumulate matmul convention as the kernel)."""
    B = h.shape[0]

    def wdot(a, w):  # bf16 operands, f32 accumulation (matches kernel dots)
        return jnp.dot(a.astype(jnp.bfloat16), w, preferred_element_type=jnp.float32)

    x0 = wdot(h.reshape(B, -1), params["w_enc"])
    x = x0
    scale = 1.0 / math.sqrt(HEAD_DIM)
    for l in range(N_LAYERS):
        qkv = wdot(x, params["w_in"][l]) + params["b_in"][l]
        attn = None
        for hh in range(N_HEAD):
            q = qkv[:, hh * HEAD_DIM:(hh + 1) * HEAD_DIM]
            k = qkv[:, D_MODEL + hh * HEAD_DIM:D_MODEL + (hh + 1) * HEAD_DIM]
            v = qkv[:, 2 * D_MODEL + hh * HEAD_DIM:2 * D_MODEL + (hh + 1) * HEAD_DIM]
            s = jnp.dot(q, k.T, preferred_element_type=jnp.float32,
                        precision=lax.Precision.HIGHEST) * scale + mask
            p = jax.nn.softmax(s, axis=-1)
            head = jnp.dot(p, v, preferred_element_type=jnp.float32,
                           precision=lax.Precision.HIGHEST)
            contrib = wdot(head, params["w_out"][l][hh * HEAD_DIM:(hh + 1) * HEAD_DIM, :])
            attn = contrib if attn is None else attn + contrib
        attn = attn + params["b_out"][l]
        x = _layer_norm(x + attn, params["ln1_w"][l], params["ln1_b"][l])
        ff = jnp.maximum(wdot(x, params["w1"][l]) + params["b1"][l], 0.0)
        ff = wdot(ff, params["w2"][l]) + params["b2"][l]
        x = _layer_norm(x + ff, params["ln2_w"][l], params["ln2_b"][l])
    return (x0 + x)[:, None, :]


if __name__ == "__main__":
    key = jax.random.PRNGKey(0)
    k_h, k_m, k_p = jax.random.split(key, 3)

    B, t_h, d_h = 8, 8, 2
    h = jax.random.normal(k_h, (B, t_h, d_h), jnp.float32)
    # additive float attention mask (PyTorch float-mask semantics)
    mask = jax.random.normal(k_m, (B, B), jnp.float32) * 0.1
    params = init_params(k_p, t_h, d_h)

    out = jax.block_until_ready(social_transformer_forward(h, mask, params))
    ref = jax.block_until_ready(reference_forward(h, mask, params))

    assert out.shape == (B, 1, D_MODEL), out.shape
    np.testing.assert_allclose(np.asarray(out), np.asarray(ref), rtol=1e-2, atol=1e-2)

    print("KERNEL_OK")
</pallas_src>

<mosaic_0001>
module attributes {stable_mosaic.version = 11 : i64} {
  func.func @social_transformer_kernel(%arg0: i32, %arg1: memref<8x16xf32, #tpu.memory_space<vmem>>, %arg2: memref<8x8xf32, #tpu.memory_space<vmem>>, %arg3: memref<16x256xbf16, #tpu.memory_space<vmem>>, %arg4: memref<1x256x1536xbf16, #tpu.memory_space<vmem>>, %arg5: memref<1x1x2560xf32, #tpu.memory_space<vmem>>, %arg6: memref<8x256xf32, #tpu.memory_space<vmem>>, %arg7: memref<8x256xf32, #tpu.memory_space<vmem>>, %arg8: memref<8x256xf32, #tpu.memory_space<vmem>>) attributes {dimension_semantics = [#tpu.dimension_semantics<arbitrary>], iteration_bounds = array<i64: 2>, scalar_prefetch = 0 : i64, scratch_operands = 2 : i64, tpu.core_type = #tpu.core_type<tc>, window_params = [{pipeline_mode = #tpu.pipeline_mode<synchronous>, transform_indices = @transform_0, window_bounds = array<i64: 8, 16>}, {pipeline_mode = #tpu.pipeline_mode<synchronous>, transform_indices = @transform_1, window_bounds = array<i64: 8, 8>}, {pipeline_mode = #tpu.pipeline_mode<synchronous>, transform_indices = @transform_2, window_bounds = array<i64: 16, 256>}, {transform_indices = @transform_3, window_bounds = array<i64: 1, 256, 1536>}, {transform_indices = @transform_4, window_bounds = array<i64: 1, 1, 2560>}, {pipeline_mode = #tpu.pipeline_mode<synchronous>, transform_indices = @transform_5, window_bounds = array<i64: 8, 256>}]} {
    %c0_i32 = arith.constant 0 : i32
    %0 = arith.cmpi eq, %arg0, %c0_i32 : i32
    %1 = arith.extui %0 : i1 to i32
    %c0_i32_0 = arith.constant 0 : i32
    %2 = arith.cmpi ne, %1, %c0_i32_0 : i32
    scf.if %2 {
      %c0_63 = arith.constant 0 : index
      %c0_64 = arith.constant 0 : index
      %138 = vector.load %arg1[%c0_63, %c0_64] : memref<8x16xf32, #tpu.memory_space<vmem>>, vector<8x16xf32>
      %139 = arith.truncf %138 : vector<8x16xf32> to vector<8x16xbf16>
      %c0_65 = arith.constant 0 : index
      %c0_66 = arith.constant 0 : index
      %140 = vector.load %arg3[%c0_65, %c0_66] : memref<16x256xbf16, #tpu.memory_space<vmem>>, vector<16x256xbf16>
      %cst_67 = arith.constant dense<0.000000e+00> : vector<8x256xf32>
      %141 = tpu.matmul %139, %140, %cst_67 {dimension_numbers = #tpu.dot_dimension_numbers<[1], [0], [0], [1], [0, 0, 1, 1], [], []>} : vector<8x16xbf16>, vector<16x256xbf16>, vector<8x256xf32> -> vector<8x256xf32>
      %c0_68 = arith.constant 0 : index
      %c0_69 = arith.constant 0 : index
      %142 = vector.load %arg8[%c0_68, %c0_69] : memref<8x256xf32, #tpu.memory_space<vmem>>, vector<8x256xf32>
      tpu.vector_store %arg8[%c0_68, %c0_69], %141 {strides = array<i32>} : memref<8x256xf32, #tpu.memory_space<vmem>>, vector<8x256xf32>,
      %c0_70 = arith.constant 0 : index
      %c0_71 = arith.constant 0 : index
      %143 = vector.load %arg7[%c0_70, %c0_71] : memref<8x256xf32, #tpu.memory_space<vmem>>, vector<8x256xf32>
      tpu.vector_store %arg7[%c0_70, %c0_71], %141 {strides = array<i32>} : memref<8x256xf32, #tpu.memory_space<vmem>>, vector<8x256xf32>,
    } else {
    }
    %c0 = arith.constant 0 : index
    %c0_1 = arith.constant 0 : index
    %3 = vector.load %arg7[%c0, %c0_1] : memref<8x256xf32, #tpu.memory_space<vmem>>, vector<8x256xf32>
    %c0_2 = arith.constant 0 : index
    %c0_3 = arith.constant 0 : index
    %4 = vector.load %arg2[%c0_2, %c0_3] : memref<8x8xf32, #tpu.memory_space<vmem>>, vector<8x8xf32>
    %c0_4 = arith.constant 0 : index
    %c0_5 = arith.constant 0 : index
    %c0_6 = arith.constant 0 : index
    %5 = vector.load %arg4[%c0_4, %c0_5, %c0_6] : memref<1x256x1536xbf16, #tpu.memory_space<vmem>>, vector<1x256x768xbf16>
    %6 = vector.shape_cast %5 : vector<1x256x768xbf16> to vector<256x768xbf16>
    %c0_7 = arith.constant 0 : index
    %c0_8 = arith.constant 0 : index
    %c1024 = arith.constant 1024 : index
    %7 = vector.load %arg4[%c0_7, %c0_8, %c1024] : memref<1x256x1536xbf16, #tpu.memory_space<vmem>>, vector<1x256x256xbf16>
    %8 = vector.shape_cast %7 : vector<1x256x256xbf16> to vector<256x256xbf16>
    %c0_9 = arith.constant 0 : index
    %c0_10 = arith.constant 0 : index
    %c1280 = arith.constant 1280 : index
    %9 = vector.load %arg4[%c0_9, %c0_10, %c1280] : memref<1x256x1536xbf16, #tpu.memory_space<vmem>>, vector<1x256x256xbf16>
    %10 = vector.shape_cast %9 : vector<1x256x256xbf16> to vector<256x256xbf16>
    %c0_11 = arith.constant 0 : index
    %c0_12 = arith.constant 0 : index
    %c0_13 = arith.constant 0 : index
    %11 = vector.load %arg5[%c0_11, %c0_12, %c0_13] : memref<1x1x2560xf32, #tpu.memory_space<vmem>>, vector<1x1x768xf32>
    %12 = vector.shape_cast %11 : vector<1x1x768xf32> to vector<1x768xf32>
    %c0_14 = arith.constant 0 : index
    %c0_15 = arith.constant 0 : index
    %c768 = arith.constant 768 : index
    %13 = vector.load %arg5[%c0_14, %c0_15, %c768] : memref<1x1x2560xf32, #tpu.memory_space<vmem>>, vector<1x1x256xf32>
    %14 = vector.shape_cast %13 : vector<1x1x256xf32> to vector<1x256xf32>
    %c0_16 = arith.constant 0 : index
    %c0_17 = arith.constant 0 : index
    %c1024_18 = arith.constant 1024 : index
    %15 = vector.load %arg5[%c0_16, %c0_17, %c1024_18] : memref<1x1x2560xf32, #tpu.memory_space<vmem>>, vector<1x1x256xf32>
    %16 = vector.shape_cast %15 : vector<1x1x256xf32> to vector<1x256xf32>
    %c0_19 = arith.constant 0 : index
    %c0_20 = arith.constant 0 : index
    %c1280_21 = arith.constant 1280 : index
    %17 = vector.load %arg5[%c0_19, %c0_20, %c1280_21] : memref<1x1x2560xf32, #tpu.memory_space<vmem>>, vector<1x1x256xf32>
    %18 = vector.shape_cast %17 : vector<1x1x256xf32> to vector<1x256xf32>
    %c0_22 = arith.constant 0 : index
    %c0_23 = arith.constant 0 : index
    %c1536 = arith.constant 1536 : index
    %19 = vector.load %arg5[%c0_22, %c0_23, %c1536] : memref<1x1x2560xf32, #tpu.memory_space<vmem>>, vector<1x1x256xf32>
    %20 = vector.shape_cast %19 : vector<1x1x256xf32> to vector<1x256xf32>
    %c0_24 = arith.constant 0 : index
    %c0_25 = arith.constant 0 : index
    %c1792 = arith.constant 1792 : index
    %21 = vector.load %arg5[%c0_24, %c0_25, %c1792] : memref<1x1x2560xf32, #tpu.memory_space<vmem>>, vector<1x1x256xf32>
    %22 = vector.shape_cast %21 : vector<1x1x256xf32> to vector<1x256xf32>
    %c0_26 = arith.constant 0 : index
    %c0_27 = arith.constant 0 : index
    %c2048 = arith.constant 2048 : index
    %23 = vector.load %arg5[%c0_26, %c0_27, %c2048] : memref<1x1x2560xf32, #tpu.memory_space<vmem>>, vector<1x1x256xf32>
    %24 = vector.shape_cast %23 : vector<1x1x256xf32> to vector<1x256xf32>
    %c0_28 = arith.constant 0 : index
    %c0_29 = arith.constant 0 : index
    %c2304 = arith.constant 2304 : index
    %25 = vector.load %arg5[%c0_28, %c0_29, %c2304] : memref<1x1x2560xf32, #tpu.memory_space<vmem>>, vector<1x1x256xf32>
    %26 = vector.shape_cast %25 : vector<1x1x256xf32> to vector<1x256xf32>
    %27 = arith.truncf %3 : vector<8x256xf32> to vector<8x256xbf16>
    %cst = arith.constant dense<0.000000e+00> : vector<8x768xf32>
    %28 = tpu.matmul %27, %6, %cst {dimension_numbers = #tpu.dot_dimension_numbers<[1], [0], [0], [1], [0, 0, 1, 1], [], []>} : vector<8x256xbf16>, vector<256x768xbf16>, vector<8x768xf32> -> vector<8x768xf32>
    %29 = vector.broadcast %12 : vector<1x768xf32> to vector<8x768xf32>
    %30 = arith.addf %28, %29 : vector<8x768xf32>
    %31 = vector.extract_strided_slice %30 {offsets = [0, 0], sizes = [8, 128], strides = [1, 1]} : vector<8x768xf32> to vector<8x128xf32>
    %32 = vector.extract_strided_slice %30 {offsets = [0, 256], sizes = [8, 128], strides = [1, 1]} : vector<8x768xf32> to vector<8x128xf32>
    %33 = vector.extract_strided_slice %30 {offsets = [0, 512], sizes = [8, 128], strides = [1, 1]} : vector<8x768xf32> to vector<8x128xf32>
    %cst_30 = arith.constant dense<0.000000e+00> : vector<8x8xf32>
    %34 = tpu.matmul %31, %32, %cst_30 {dimension_numbers = #tpu.dot_dimension_numbers<[1], [1], [0], [0], [0, 0, 1, 0], [], []>} : vector<8x128xf32>, vector<8x128xf32>, vector<8x8xf32> -> vector<8x8xf32>
    %cst_31 = arith.constant 0.0883883461 : f32
    %35 = vector.broadcast %cst_31 : f32 to vector<8x8xf32>
    %36 = arith.mulf %34, %35 : vector<8x8xf32>
    %37 = arith.addf %36, %4 : vector<8x8xf32>
    %cst_32 = arith.constant dense<0xFF800000> : vector<8xf32>
    %38 = vector.multi_reduction <maximumf>, %37, %cst_32 [1] : vector<8x8xf32> to vector<8xf32>
    %39 = vector.shape_cast %38 : vector<8xf32> to vector<8x1xf32>
    %40 = vector.broadcast %39 : vector<8x1xf32> to vector<8x8xf32>
    %41 = arith.subf %37, %40 : vector<8x8xf32>
    %42 = math.exp %41 : vector<8x8xf32>
    %cst_33 = arith.constant dense<0.000000e+00> : vector<8xf32>
    %43 = vector.multi_reduction <add>, %42, %cst_33 [1] : vector<8x8xf32> to vector<8xf32>
    %44 = vector.shape_cast %43 : vector<8xf32> to vector<8x1xf32>
    %45 = tpu.reciprocal %44 {approx = true} : vector<8x1xf32> -> vector<8x1xf32>
    %46 = vector.broadcast %45 : vector<8x1xf32> to vector<8x8xf32>
    %47 = arith.mulf %42, %46 : vector<8x8xf32>
    %cst_34 = arith.constant dense<0.000000e+00> : vector<8x128xf32>
    %48 = tpu.matmul %47, %33, %cst_34 {dimension_numbers = #tpu.dot_dimension_numbers<[1], [0], [0], [1], [0, 0, 1, 1], [], []>} : vector<8x8xf32>, vector<8x128xf32>, vector<8x128xf32> -> vector<8x128xf32>
    %c0_35 = arith.constant 0 : index
    %c0_36 = arith.constant 0 : index
    %c768_37 = arith.constant 768 : index
    %49 = vector.load %arg4[%c0_35, %c0_36, %c768_37] : memref<1x256x1536xbf16, #tpu.memory_space<vmem>>, vector<1x128x256xbf16>
    %50 = vector.shape_cast %49 : vector<1x128x256xbf16> to vector<128x256xbf16>
    %51 = arith.truncf %48 : vector<8x128xf32> to vector<8x128xbf16>
    %cst_38 = arith.constant dense<0.000000e+00> : vector<8x256xf32>
    %52 = tpu.matmul %51, %50, %cst_38 {dimension_numbers = #tpu.dot_dimension_numbers<[1], [0], [0], [1], [0, 0, 1, 1], [], []>} : vector<8x128xbf16>, vector<128x256xbf16>, vector<8x256xf32> -> vector<8x256xf32>
    %53 = vector.extract_strided_slice %30 {offsets = [0, 128], sizes = [8, 128], strides = [1, 1]} : vector<8x768xf32> to vector<8x128xf32>
    %54 = vector.extract_strided_slice %30 {offsets = [0, 384], sizes = [8, 128], strides = [1, 1]} : vector<8x768xf32> to vector<8x128xf32>
    %55 = vector.extract_strided_slice %30 {offsets = [0, 640], sizes = [8, 128], strides = [1, 1]} : vector<8x768xf32> to vector<8x128xf32>
    %cst_39 = arith.constant dense<0.000000e+00> : vector<8x8xf32>
    %56 = tpu.matmul %53, %54, %cst_39 {dimension_numbers = #tpu.dot_dimension_numbers<[1], [1], [0], [0], [0, 0, 1, 0], [], []>} : vector<8x128xf32>, vector<8x128xf32>, vector<8x8xf32> -> vector<8x8xf32>
    %cst_40 = arith.constant 0.0883883461 : f32
    %57 = vector.broadcast %cst_40 : f32 to vector<8x8xf32>
    %58 = arith.mulf %56, %57 : vector<8x8xf32>
    %59 = arith.addf %58, %4 : vector<8x8xf32>
    %cst_41 = arith.constant dense<0xFF800000> : vector<8xf32>
    %60 = vector.multi_reduction <maximumf>, %59, %cst_41 [1] : vector<8x8xf32> to vector<8xf32>
    %61 = vector.shape_cast %60 : vector<8xf32> to vector<8x1xf32>
    %62 = vector.broadcast %61 : vector<8x1xf32> to vector<8x8xf32>
    %63 = arith.subf %59, %62 : vector<8x8xf32>
    %64 = math.exp %63 : vector<8x8xf32>
    %cst_42 = arith.constant dense<0.000000e+00> : vector<8xf32>
    %65 = vector.multi_reduction <add>, %64, %cst_42 [1] : vector<8x8xf32> to vector<8xf32>
    %66 = vector.shape_cast %65 : vector<8xf32> to vector<8x1xf32>
    %67 = tpu.reciprocal %66 {approx = true} : vector<8x1xf32> -> vector<8x1xf32>
    %68 = vector.broadcast %67 : vector<8x1xf32> to vector<8x8xf32>
    %69 = arith.mulf %64, %68 : vector<8x8xf32>
    %cst_43 = arith.constant dense<0.000000e+00> : vector<8x128xf32>
    %70 = tpu.matmul %69, %55, %cst_43 {dimension_numbers = #tpu.dot_dimension_numbers<[1], [0], [0], [1], [0, 0, 1, 1], [], []>} : vector<8x8xf32>, vector<8x128xf32>, vector<8x128xf32> -> vector<8x128xf32>
    %c0_44 = arith.constant 0 : index
    %c128 = arith.constant 128 : index
    %c768_45 = arith.constant 768 : index
    %71 = vector.load %arg4[%c0_44, %c128, %c768_45] : memref<1x256x1536xbf16, #tpu.memory_space<vmem>>, vector<1x128x256xbf16>
    %72 = vector.shape_cast %71 : vector<1x128x256xbf16> to vector<128x256xbf16>
    %73 = arith.truncf %70 : vector<8x128xf32> to vector<8x128xbf16>
    %cst_46 = arith.constant dense<0.000000e+00> : vector<8x256xf32>
    %74 = tpu.matmul %73, %72, %cst_46 {dimension_numbers = #tpu.dot_dimension_numbers<[1], [0], [0], [1], [0, 0, 1, 1], [], []>} : vector<8x128xbf16>, vector<128x256xbf16>, vector<8x256xf32> -> vector<8x256xf32>
    %75 = arith.addf %52, %74 : vector<8x256xf32>
    %76 = vector.broadcast %14 : vector<1x256xf32> to vector<8x256xf32>
    %77 = arith.addf %75, %76 : vector<8x256xf32>
    %78 = arith.addf %3, %77 : vector<8x256xf32>
    %cst_47 = arith.constant dense<0.000000e+00> : vector<8xf32>
    %79 = vector.multi_reduction <add>, %78, %cst_47 [1] : vector<8x256xf32> to vector<8xf32>
    %80 = vector.shape_cast %79 : vector<8xf32> to vector<8x1xf32>
    %cst_48 = arith.constant 2.560000e+02 : f32
    %81 = vector.broadcast %cst_48 : f32 to vector<8x1xf32>
    %82 = arith.divf %80, %81 : vector<8x1xf32>
    %83 = vector.broadcast %82 : vector<8x1xf32> to vector<8x256xf32>
    %84 = arith.subf %78, %83 : vector<8x256xf32>
    %85 = arith.mulf %84, %84 : vector<8x256xf32>
    %cst_49 = arith.constant dense<0.000000e+00> : vector<8xf32>
    %86 = vector.multi_reduction <add>, %85, %cst_49 [1] : vector<8x256xf32> to vector<8xf32>
    %87 = vector.shape_cast %86 : vector<8xf32> to vector<8x1xf32>
    %cst_50 = arith.constant 2.560000e+02 : f32
    %88 = vector.broadcast %cst_50 : f32 to vector<8x1xf32>
    %89 = arith.divf %87, %88 : vector<8x1xf32>
    %90 = vector.broadcast %82 : vector<8x1xf32> to vector<8x256xf32>
    %91 = arith.subf %78, %90 : vector<8x256xf32>
    %cst_51 = arith.constant 9.99999974E-6 : f32
    %92 = vector.broadcast %cst_51 : f32 to vector<8x1xf32>
    %93 = arith.addf %89, %92 : vector<8x1xf32>
    %94 = math.rsqrt %93 : vector<8x1xf32>
    %95 = vector.broadcast %94 : vector<8x1xf32> to vector<8x256xf32>
    %96 = arith.mulf %91, %95 : vector<8x256xf32>
    %97 = vector.broadcast %16 : vector<1x256xf32> to vector<8x256xf32>
    %98 = arith.mulf %96, %97 : vector<8x256xf32>
    %99 = vector.broadcast %18 : vector<1x256xf32> to vector<8x256xf32>
    %100 = arith.addf %98, %99 : vector<8x256xf32>
    %101 = arith.truncf %100 : vector<8x256xf32> to vector<8x256xbf16>
    %cst_52 = arith.constant dense<0.000000e+00> : vector<8x256xf32>
    %102 = tpu.matmul %101, %8, %cst_52 {dimension_numbers = #tpu.dot_dimension_numbers<[1], [0], [0], [1], [0, 0, 1, 1], [], []>} : vector<8x256xbf16>, vector<256x256xbf16>, vector<8x256xf32> -> vector<8x256xf32>
    %103 = vector.broadcast %20 : vector<1x256xf32> to vector<8x256xf32>
    %104 = arith.addf %102, %103 : vector<8x256xf32>
    %cst_53 = arith.constant 0.000000e+00 : f32
    %105 = vector.broadcast %cst_53 : f32 to vector<8x256xf32>
    %106 = arith.maximumf %104, %105 : vector<8x256xf32>
    %107 = arith.truncf %106 : vector<8x256xf32> to vector<8x256xbf16>
    %cst_54 = arith.constant dense<0.000000e+00> : vector<8x256xf32>
    %108 = tpu.matmul %107, %10, %cst_54 {dimension_numbers = #tpu.dot_dimension_numbers<[1], [0], [0], [1], [0, 0, 1, 1], [], []>} : vector<8x256xbf16>, vector<256x256xbf16>, vector<8x256xf32> -> vector<8x256xf32>
    %109 = vector.broadcast %22 : vector<1x256xf32> to vector<8x256xf32>
    %110 = arith.addf %108, %109 : vector<8x256xf32>
    %111 = arith.addf %100, %110 : vector<8x256xf32>
    %cst_55 = arith.constant dense<0.000000e+00> : vector<8xf32>
    %112 = vector.multi_reduction <add>, %111, %cst_55 [1] : vector<8x256xf32> to vector<8xf32>
    %113 = vector.shape_cast %112 : vector<8xf32> to vector<8x1xf32>
    %cst_56 = arith.constant 2.560000e+02 : f32
    %114 = vector.broadcast %cst_56 : f32 to vector<8x1xf32>
    %115 = arith.divf %113, %114 : vector<8x1xf32>
    %116 = vector.broadcast %115 : vector<8x1xf32> to vector<8x256xf32>
    %117 = arith.subf %111, %116 : vector<8x256xf32>
    %118 = arith.mulf %117, %117 : vector<8x256xf32>
    %cst_57 = arith.constant dense<0.000000e+00> : vector<8xf32>
    %119 = vector.multi_reduction <add>, %118, %cst_57 [1] : vector<8x256xf32> to vector<8xf32>
    %120 = vector.shape_cast %119 : vector<8xf32> to vector<8x1xf32>
    %cst_58 = arith.constant 2.560000e+02 : f32
    %121 = vector.broadcast %cst_58 : f32 to vector<8x1xf32>
    %122 = arith.divf %120, %121 : vector<8x1xf32>
    %123 = vector.broadcast %115 : vector<8x1xf32> to vector<8x256xf32>
    %124 = arith.subf %111, %123 : vector<8x256xf32>
    %cst_59 = arith.constant 9.99999974E-6 : f32
    %125 = vector.broadcast %cst_59 : f32 to vector<8x1xf32>
    %126 = arith.addf %122, %125 : vector<8x1xf32>
    %127 = math.rsqrt %126 : vector<8x1xf32>
    %128 = vector.broadcast %127 : vector<8x1xf32> to vector<8x256xf32>
    %129 = arith.mulf %124, %128 : vector<8x256xf32>
    %130 = vector.broadcast %24 : vector<1x256xf32> to vector<8x256xf32>
    %131 = arith.mulf %129, %130 : vector<8x256xf32>
    %132 = vector.broadcast %26 : vector<1x256xf32> to vector<8x256xf32>
    %133 = arith.addf %131, %132 : vector<8x256xf32>
    %c0_60 = arith.constant 0 : index
    %c0_61 = arith.constant 0 : index
    %134 = vector.load %arg7[%c0_60, %c0_61] : memref<8x256xf32, #tpu.memory_space<vmem>>, vector<8x256xf32>
    tpu.vector_store %arg7[%c0_60, %c0_61], %133 {strides = array<i32>} : memref<8x256xf32, #tpu.memory_space<vmem>>, vector<8x256xf32>,
    %c1_i32 = arith.constant 1 : i32
    %135 = arith.cmpi eq, %arg0, %c1_i32 : i32
    %136 = arith.extui %135 : i1 to i32
    %c0_i32_62 = arith.constant 0 : i32
    %137 = arith.cmpi ne, %136, %c0_i32_62 : i32
    scf.if %137 {
      %c0_63 = arith.constant 0 : index
      %c0_64 = arith.constant 0 : index
      %138 = vector.load %arg8[%c0_63, %c0_64] : memref<8x256xf32, #tpu.memory_space<vmem>>, vector<8x256xf32>
      %c0_65 = arith.constant 0 : index
      %c0_66 = arith.constant 0 : index
      %139 = vector.load %arg7[%c0_65, %c0_66] : memref<8x256xf32, #tpu.memory_space<vmem>>, vector<8x256xf32>
      %140 = arith.addf %138, %139 : vector<8x256xf32>
      %c0_67 = arith.constant 0 : index
      %c0_68 = arith.constant 0 : index
      %141 = vector.load %arg6[%c0_67, %c0_68] : memref<8x256xf32, #tpu.memory_space<vmem>>, vector<8x256xf32>
      tpu.vector_store %arg6[%c0_67, %c0_68], %140 {strides = array<i32>} : memref<8x256xf32, #tpu.memory_space<vmem>>, vector<8x256xf32>,
    } else {
    }
    return
  }
  func.func @transform_0(%arg0: i32) -> (i32, i32) {
    %c0_i32 = arith.constant 0 : i32
    %c0_i32_0 = arith.constant 0 : i32
    %c0_i32_1 = arith.constant 0 : i32
    return %c0_i32, %c0_i32_0 : i32, i32
  }
  func.func @transform_1(%arg0: i32) -> (i32, i32) {
    %c0_i32 = arith.constant 0 : i32
    %c0_i32_0 = arith.constant 0 : i32
    %c0_i32_1 = arith.constant 0 : i32
    return %c0_i32, %c0_i32_0 : i32, i32
  }
  func.func @transform_2(%arg0: i32) -> (i32, i32) {
    %c0_i32 = arith.constant 0 : i32
    %c0_i32_0 = arith.constant 0 : i32
    %c0_i32_1 = arith.constant 0 : i32
    return %c0_i32, %c0_i32_0 : i32, i32
  }
  func.func @transform_3(%arg0: i32) -> (i32, i32, i32) {
    %c0_i32 = arith.constant 0 : i32
    %c0_i32_0 = arith.constant 0 : i32
    %c0_i32_1 = arith.constant 0 : i32
    return %arg0, %c0_i32, %c0_i32_0 : i32, i32, i32
  }
  func.func @transform_4(%arg0: i32) -> (i32, i32, i32) {
    %c0_i32 = arith.constant 0 : i32
    %c0_i32_0 = arith.constant 0 : i32
    %c0_i32_1 = arith.constant 0 : i32
    return %arg0, %c0_i32, %c0_i32_0 : i32, i32, i32
  }
  func.func @transform_5(%arg0: i32) -> (i32, i32) {
    %c0_i32 = arith.constant 0 : i32
    %c0_i32_0 = arith.constant 0 : i32
    %c0_i32_1 = arith.constant 0 : i32
    return %c0_i32, %c0_i32_0 : i32, i32
  }
}

</mosaic_0001>

<bundles_post_ra>
// kernel: tpu_custom_call.1
= control target key start
LH: loop header
LB: loop body
LE: loop exit
PB: predicated region body
PF: predicated region fallthrough
CT: control target
= control target key end

     0   :  { %s3847_s0 = inlined_call_operand.hbm [shape: f32[8,16], index: 0, kind: input, shape index: {}]   ;;  %s3848_s1 = inlined_call_operand.hbm [shape: f32[8,8], index: 1, kind: input, shape index: {}]   ;;  %s3849_s2 = inlined_call_operand.hbm [shape: bf16[16,256], index: 2, kind: input, shape index: {}]   ;;  %s3850_s3 = inlined_call_operand.hbm [shape: bf16[2,256,1536], index: 3, kind: input, shape index: {}]   ;;  %s3851_s4 = inlined_call_operand.hbm [shape: f32[2,1,2560], index: 4, kind: input, shape index: {}]   ;;  %s3852_s5 = inlined_call_operand.hbm [shape: f32[8,256], index: 5, kind: output, shape index: {}]  }
   0x1   :  { %3860 = sst [smem:[#allocation18_spill]] %s3848_s1 }
   0x2   :  { %10 = vsyncpa [#allocation5], 0 }
   0x3   :  { %11 = vsyncpa [#allocation8], 0 }
   0x4   :  { %12 = vsyncpa [#allocation11], 0 }
   0x5   :  { %14 = vsyncpa [#allocation11 + $0x1], 0 }
   0x6   :  { %15 = vsyncpa [#allocation6], 0  ;;  %s3328_s18 = smov 0   ;;  %s3330_s19 = smov 0  }
   0x7   :  { %s3332_s20 = smov 0   ;;  %s3334_s21 = smov 0  }
   0x8 LB: > { %s3347_s22 = sadd.s32 4294967295, %s3282_s21   ;;  %p104_p0 = scmp.ne.s32.totalorder %s3274_s19, %s3270_s18  ;;  %s3282_s21 = sphi %s3334_s21, %s3885_s21   ;;  %s3278_s20 = sphi %s3332_s20, %s3884_s20   ;;  %s3274_s19 = sphi %s3330_s19, %s3883_s19   ;;  %s3270_s18 = sphi %s3328_s18, %s3882_s18  }
   0x9   : > { %p3853_p1 = scmp.eq.s32.totalorder %s3347_s22, 0  ;;  %p2425_p2 = scmp.ge.s32.totalorder %s3282_s21, 1 }
   0xa   : > { %p162_p3 = scmp.lt.s32.totalorder %s3282_s21, 3  ;;  %s3284_s25 = smov [#allocation7]  }
   0xb   : > { %p3356_p5 = por %p3853_p1, %p104_p0  ;;  %s186_s26 = sshll.u32 %s3284_s25, 4  ;;  %s187_s26 = int_to_ptr.vmem [resolvable:$true] %s186_s26 }
   0xc   : > { %p3360_p6 = pnand %p2425_p2, %p162_p3  ;;  %s3367_s27 = sadd.s32 1, %s3282_s21  }
   0xd   : > { %s3861_s23 = scalar_select %p3356_p5, 1, 0 }
   0xe   : > { %s3862_s24 = scalar_select %p3360_p6, 1, 0 }
   0xf   : > { %p2693_p7 = pneg %p3360_p6  ;;  %s88_s29 = ssub.s32 %s3282_s21, %s3367_s27 }
  0x10   : > { %p3377_p9 = scmp.eq.s32.totalorder %s88_s29, 0  ;;  %s91_s6 = sadd.s32 1, %s3278_s20 }
  0x11   : > { %p3371_p8 = pnand %p2693_p7, %p3853_p1  ;;  %s3865_s1 = sld [smem:[#allocation18_spill]] }
  0x12   : > { %s3864_s30 = scalar_select %p3377_p9, 1, 0 }
  0x13   : > { %s3863_s28 = scalar_select %p3371_p8, 1, 0 }
  0x14   : > { %p3392_p12 = pneg %p3371_p8 }
  0x17   : > { %s3066_s9 = scalar_lea.hbm %s3865_s1, 128 }
  0x18   : > { %p3067_p11 = scmp.ne.s32.totalorder %s3865_s1, %s3066_s9  ;;  %p3073_p2 = scmp.lt.u32.totalorder %s3066_s9, %s3865_s1 }
  0x1a   : > { %p3069_p13 = pnand %p3392_p12, %p3067_p11 }
  0x1c   : > { %p3070_p0 = pneg %p3069_p13 }
  0x1e   : > { %p3075_p3 = pnand %p3073_p2, %p3070_p0 }
  0x20   : > { %3078 = shalt.err (!%p3075_p3)
}
  0x21   : > { %s3079_s15 = scalar_lea.vmem %s187_s26, 128  ;;  %p3087_p10 = scmp.lt.s32.totalorder %s187_s26, %s187_s26 }
  0x22   : > { %p3080_p7 = scmp.ne.s32.totalorder %s187_s26, %s3079_s15  ;;  %p3088_p5 = scmp.lt.s32.totalorder %s3079_s15, %s3079_s15 }
  0x24   : > { %p3082_p4 = pnand %p3080_p7, %p3392_p12  ;;  %p3089_p6 = por %p3088_p5, %p3087_p10 }
  0x26   : > { %p3083_p1 = pneg %p3082_p4 }
  0x28   : > { %p3090_p9 = pnand %p3089_p6, %p3083_p1 }
  0x2a   : > { %3093 = shalt.err (!%p3090_p9)
}
  0x2b   : > { %2699 = dma.hbm_to_vmem [thread:$0]  (!%p3371_p8), %s3865_s1, 128, %s187_s26, [#allocation8]  }
  0x2c   : > { %p3867_p4 = scmp.ne.s32.totalorder %s3864_s30, 0  ;;  %p99_p1 = scmp.eq.s32.totalorder %s3282_s21, 0 }
  0x2d   : > { %p2713_p5 = scmp.lt.s32.totalorder %s3282_s21, 2  ;;  %s210_s25 = sand.u32 1, %s3282_s21  }
  0x2e   : > { %s3411_s18 = scalar_select %p3867_p4, %s3278_s20, %s91_s6  }
  0x2f   : > { %s3858_s29 = sand.u32 1, %s3278_s20   ;;  %p3868_p6 = scmp.ne.s32.totalorder %s3278_s20, %s3274_s19 }
  0x30   : > { %s2667_s7 = smul.u32 1536, %s3858_s29  ;;  %s3434_s13 = scalar_lea.sflag [#allocation11], %s210_s25 }
  0x31   : > { %p100_p9 = por %p99_p1, %p3868_p6  ;;  %s2668_s8 = smul.u32 24576, %s3282_s21 }
  0x32   : > { %s214_s30 = scalar_lea.vmem [#allocation10], %s2667_s7  ;;  %s3099_s17 = scalar_lea.hbm %s3850_s3, 49152 }
  0x33   : > { %p3423_p10 = pnand %p2713_p5, %p100_p9  ;;  %s3430_s26 = scalar_lea.hbm %s3850_s3, %s2668_s8 }
  0x34   : > { %s221_s6 = sshll.u32 %s214_s30, 4  ;;  %s3094_s14 = scalar_lea.hbm %s3430_s26, 24576  ;;  %s3432_s6 = int_to_ptr.vmem [resolvable:$true] %s221_s6 }
  0x35   : > { %p3095_p11 = scmp.ne.s32.totalorder %s3430_s26, %s3094_s14  ;;  %p3859_p13 = pneg %p3423_p10 }
  0x36   : > { %p3100_p3 = scmp.lt.u32.totalorder %s3430_s26, %s3850_s3  ;;  %p3101_p7 = scmp.lt.u32.totalorder %s3099_s17, %s3094_s14 }
  0x37   : > { %p3097_p0 = pnand %p3859_p13, %p3095_p11  ;;  %p3103_p1 = scmp.lt.u32.totalorder %s3094_s14, %s3430_s26 }
  0x38   : > { %p3102_p4 = por %p3101_p7, %p3100_p3 }
  0x39   : > { %p3098_p2 = pneg %p3097_p0 }
  0x3a   : > { %p3104_p5 = por %p3103_p1, %p3102_p4 }
  0x3c   : > { %p3105_p6 = pnand %p3104_p5, %p3098_p2 }
  0x3e   : > { %3108 = shalt.err (!%p3105_p6)
}
  0x3f   : > { %s3109_s25 = scalar_lea.vmem %s3432_s6, 24576  ;;  %s3285_s7 = smov [#allocation10]  }
  0x40   : > { %p3110_p9 = scmp.ne.s32.totalorder %s3432_s6, %s3109_s25  ;;  %s3114_s11 = sshll.u32 %s3285_s7, 4  ;;  %s3115_s11 = int_to_ptr.vmem [resolvable:$false] %s3114_s11 }
  0x41   : > { %s3116_s30 = scalar_lea.vmem %s3115_s11, 49152  ;;  %p3117_p8 = scmp.lt.s32.totalorder %s3432_s6, %s3115_s11 }
  0x42   : > { %p3112_p11 = pnand %p3110_p9, %p3859_p13  ;;  %p3118_p3 = scmp.lt.s32.totalorder %s3116_s30, %s3109_s25 }
  0x44   : > { %p3113_p0 = pneg %p3112_p11  ;;  %p3119_p7 = por %p3118_p3, %p3117_p8 }
  0x46   : > { %p3120_p4 = pnand %p3119_p7, %p3113_p0 }
  0x48   : > { %3123 = shalt.err (!%p3120_p4)
}
  0x49   : > { %s3286_s14 = smov 768   ;;  %s3287_s15 = smov 48  }
  0x4a   : > { %2706 = dma.hbm_to_vmem [thread:$0]  (!%p3423_p10), %s3430_s26, 24576, %s3432_s6, %s3434_s13, %s3286_s14, %s3286_s14, %s3287_s15  }
  0x4b   : > { %s3288_s16 = smov [#allocation4]   ;;  %s3289_s8 = smov [#allocation9]  }
  0x4c   : > { %s175_s17 = sshll.u32 %s3288_s16, 4  ;;  %s196_s10 = sshll.u32 %s3289_s8, 4  ;;  %s176_s17 = int_to_ptr.vmem [resolvable:$true] %s175_s17  ;;  %s3462_s10 = int_to_ptr.vmem [resolvable:$true] %s196_s10 }
  0x4d   : > { %s3124_s11 = scalar_lea.hbm %s3847_s0, 128 }
  0x4e   : > { %p3125_p8 = scmp.ne.s32.totalorder %s3847_s0, %s3124_s11  ;;  %p3131_p5 = scmp.lt.u32.totalorder %s3124_s11, %s3847_s0 }
  0x50   : > { %p3127_p2 = pnand %p3125_p8, %p3392_p12 }
  0x52   : > { %p3128_p1 = pneg %p3127_p2 }
  0x54   : > { %p3133_p6 = pnand %p3131_p5, %p3128_p1 }
  0x56   : > { %3136 = shalt.err (!%p3133_p6)
}
  0x57   : > { %s3137_s6 = scalar_lea.vmem %s176_s17, 128  ;;  %p3145_p3 = scmp.lt.s32.totalorder %s176_s17, %s176_s17 }
  0x58   : > { %p3138_p9 = scmp.ne.s32.totalorder %s176_s17, %s3137_s6  ;;  %p3146_p7 = scmp.lt.s32.totalorder %s3137_s6, %s3137_s6 }
  0x5a   : > { %p3140_p11 = pnand %p3138_p9, %p3392_p12  ;;  %p3147_p4 = por %p3146_p7, %p3145_p3 }
  0x5c   : > { %p3141_p0 = pneg %p3140_p11 }
  0x5e   : > { %p3148_p13 = pnand %p3147_p4, %p3141_p0 }
  0x60   : > { %3151 = shalt.err (!%p3148_p13)
}
  0x61   : > { %p3870_p8 = scmp.ne.s32.totalorder %s3863_s28, 0  ;;  %s3152_s16 = scalar_lea.hbm %s3849_s2, 256 }
  0x62   : > { %p3153_p2 = scmp.ne.s32.totalorder %s3849_s2, %s3152_s16  ;;  %p3159_p13 = scmp.lt.u32.totalorder %s3152_s16, %s3849_s2 }
  0x63   : > { %2696 = dma.hbm_to_vmem [thread:$0]  (!%p3870_p8), %s3847_s0, 128, %s176_s17, [#allocation5]  }
  0x64   : > { %p3155_p1 = pnand %p3153_p2, %p3392_p12 }
  0x66   : > { %p3156_p5 = pneg %p3155_p1 }
  0x68   : > { %p3161_p6 = pnand %p3159_p13, %p3156_p5 }
  0x6a   : > { %3164 = shalt.err (!%p3161_p6)
}
  0x6b   : > { %s3165_s17 = scalar_lea.vmem %s3462_s10, 256  ;;  %p3173_p3 = scmp.lt.s32.totalorder %s3462_s10, %s3462_s10 }
  0x6c   : > { %p3166_p9 = scmp.ne.s32.totalorder %s3462_s10, %s3165_s17  ;;  %p3174_p7 = scmp.lt.s32.totalorder %s3165_s17, %s3165_s17 }
  0x6e   : > { %p3168_p11 = pnand %p3166_p9, %p3392_p12  ;;  %p3175_p4 = por %p3174_p7, %p3173_p3 }
  0x70   : > { %p3169_p0 = pneg %p3168_p11 }
  0x72   : > { %p3176_p2 = pnand %p3175_p4, %p3169_p0 }
  0x74   : > { %3179 = shalt.err (!%p3176_p2)
}
  0x75   : > { %s3290_s30 = smov 128   ;;  %s3291_s26 = smov 8  }
  0x76   : > { %2702 = dma.hbm_to_vmem [thread:$0]  (!%p3870_p8), %s3849_s2, 256, %s3462_s10, [#allocation8], %s3290_s30, %s3290_s30, %s3291_s26  }
  0x77   : > { %s3871_s12 = sand.u32 1, %s3278_s20   ;;  %s2670_s1 = smul.u32 320, %s3282_s21 }
  0x78   : > { %s2669_s14 = smul.u32 20, %s3871_s12  ;;  %p3872_p1 = pneg %p3423_p10 }
  0x79   : > { %s3511_s8 = scalar_lea.hbm %s3851_s4, %s2670_s1  ;;  %s3185_s11 = scalar_lea.hbm %s3851_s4, 640 }
  0x7a   : > { %s235_s25 = scalar_lea.vmem [#allocation12], %s2669_s14  ;;  %s3180_s28 = scalar_lea.hbm %s3511_s8, 320 }
  0x7b   : > { %s243_s7 = sshll.u32 %s235_s25, 4  ;;  %p3181_p12 = scmp.ne.s32.totalorder %s3511_s8, %s3180_s28  ;;  %s244_s7 = int_to_ptr.vmem [resolvable:$true] %s243_s7 }
  0x7c   : > { %p3186_p13 = scmp.lt.u32.totalorder %s3511_s8, %s3851_s4  ;;  %p3187_p6 = scmp.lt.u32.totalorder %s3185_s11, %s3180_s28 }
  0x7d   : > { %p3183_p8 = pnand %p3181_p12, %p3872_p1  ;;  %p3189_p11 = scmp.lt.u32.totalorder %s3180_s28, %s3511_s8 }
  0x7e   : > { %p3188_p9 = por %p3187_p6, %p3186_p13 }
  0x7f   : > { %p3184_p5 = pneg %p3183_p8 }
  0x80   : > { %p3190_p0 = por %p3189_p11, %p3188_p9 }
  0x82   : > { %p3191_p3 = pnand %p3190_p0, %p3184_p5 }
  0x84   : > { %3194 = shalt.err (!%p3191_p3)
}
  0x85   : > { %s3195_s26 = scalar_lea.vmem %s244_s7, 320  ;;  %p3873_p4 = pmov %p3872_p1 }
  0x86   : > { %p3196_p7 = scmp.ne.s32.totalorder %s244_s7, %s3195_s26  ;;  %s3292_s6 = smov [#allocation12]  }
  0x87   : > { %s3200_s29 = sshll.u32 %s3292_s6, 4  ;;  %s3201_s29 = int_to_ptr.vmem [resolvable:$false] %s3200_s29 }
  0x88   : > { %p3198_p2 = pnand %p3196_p7, %p3873_p4  ;;  %s3202_s12 = scalar_lea.vmem %s3201_s29, 640 }
  0x89   : > { %p3203_p1 = scmp.lt.s32.totalorder %s244_s7, %s3201_s29  ;;  %p3204_p8 = scmp.lt.s32.totalorder %s3202_s12, %s3195_s26 }
  0x8a   : > { %p3199_p12 = pneg %p3198_p2 }
  0x8b   : > { %p3205_p6 = por %p3204_p8, %p3203_p1 }
  0x8d   : > { %p3206_p13 = pnand %p3205_p6, %p3199_p12 }
  0x8f   : > { %3209 = shalt.err (!%p3206_p13)
}
  0x90   : > { %2709 = dma.hbm_to_vmem [thread:$0]  (!%p3423_p10), %s3511_s8, 320, %s244_s7, %s3434_s13  }
  0x91   : > { %p3874_p5 = scmp.ne.s32.totalorder %s3862_s24, 0 }
  0x92   : > { %p3875_p9 = scmp.eq.s32.totalorder (!%p3874_p5), %s3347_s22, 0 }
  0x93   : > { %252 = sbr.rel (%p3874_p5) target bundleno = 2768 (0xad0), region = 40 }
  0x9a   : > { %3253 = dma.done.wait (%p3875_p9), [#allocation5], 128   ;;  %p3876_p11 = pmov %p3875_p9 }
  0x9b   : > { %p3877_p0 = pmov %p3875_p9 }
  0x9c   : > { %3255 = vsyncadd (%p3876_p11), [#allocation5], 4294967168 }
  0x9d   : > { %3257 = dma.done.wait (%p3877_p0), [#allocation8], 384   ;;  %p3878_p3 = pmov %p3877_p0 }
  0x9e   : > { %s266_s9 = sand.u32 1, %s3347_s22   ;;  %s268_s13 = sand.u32 1, %s3274_s19  }
  0x9f   : > { %3259 = vsyncadd (%p3878_p3), [#allocation8], 4294966912  ;;  %s2671_s14 = smul.u32 1536, %s268_s13  ;;  %s267_s24 = scalar_lea.sflag [#allocation11], %s266_s9 }
  0xa0   : > { %p3879_p10 = scmp.ne.s32.totalorder %s3861_s23, 0 }
  0xa1   : > { %s3545_s1 = scalar_lea.vmem [#allocation10], %s2671_s14 }
  0xa2   : > { %3261 = dma.done.wait (%p3879_p10), %s267_s24, 24896  }
  0xa3   : > { %3263 = vsyncadd (%p3879_p10), %s267_s24, 4294942400  ;;  %s2672_s15 = smul.u32 20, %s268_s13  ;;  %p3880_p7 = scmp.ne.s32.totalorder %s3347_s22, 0 }
  0xa4   : > { %v2763_v0 = vld [vmem:[#allocation9 + $0x4] ss:$8 sps:$4 sm:$0xff] (!%p3880_p7)   ;;  %v2765_v1 = vld [vmem:[#allocation9] ss:$8 sps:$4 sm:$0xff] (!%p3880_p7)   ;;  %v3293_v2 = vmov (!%p3880_p7), 0   ;;  %v311_v3 = vld [vmem:[#allocation4] sm:$0xff] (!%p3880_p7) }
  0xa5   : > { %s3551_s16 = scalar_lea.vmem [#allocation12], %s2672_s15  ;;  %310 = sbr.rel (%p3880_p7) target bundleno = 384 (0x180), region = 64  ;;  %361 = vmatprep.mubr.bf16.mxu0 (!%p3880_p7), %v3293_v2  ;;  %329 = vmatprep.subr.bf16.mxu0 (!%p3880_p7), %v2763_v0  ;;  %v312_v4 = vpack.c.bf16 (!%p3880_p7), %v311_v3, %v311_v3  ;;  %vm325_vm0 = vcmask (!%p3880_p7), 130048  }
  0xa6   : > { %330 = vmatpush1.bf16.msra.mxu0 (!%p3880_p7), %v2765_v1 }
  0xa9   : > { %2439 = vmatmul.mubr.msk.bf16.vlgmr.msra.gmra.mrb[0].mxu0 (!%p3880_p7), %vm325_vm0, %v312_v4 }
 0x17c   : > { %v363_v5 = vpop.f32.mrb[0].mxu0 }
 0x17d   : > { %370 = vst [vmem:[#allocation3] sm:$0xff] %v363_v5  ;;  %372 = vst [vmem:[#allocation2] sm:$0xff] %v363_v5  ;;  %v365_v6 = vpop.f32.mrb[1].mxu0 }
 0x17e   : > { %371 = vst [vmem:[#allocation3 + $0x8] sm:$0xff] %v365_v6  ;;  %373 = vst [vmem:[#allocation2 + $0x8] sm:$0xff] %v365_v6  ;;  %v367_v7 = vpop.f32.mrb[2].mxu0 }
 0x17f   : > { %v368_v8 = vpop.f32.mrb[3].mxu0 }
 0x180 PF: > { %v2766_v9 = vld [vmem:[%s3545_s1 + $0xc] ss:$48 sps:$4 sm:$0xff]   ;;  %v2768_v10 = vld [vmem:[%s3545_s1 + $0x8] ss:$48 sps:$4 sm:$0xff]   ;;  %v2769_v11 = vld [vmem:[%s3545_s1 + $0x4] ss:$48 sps:$4 sm:$0xff]  }
 0x181   : > { %1099 = vmatprep.subr.bf16.mxu1 %v2766_v9  ;;  %v2771_v12 = vld [vmem:[%s3545_s1] ss:$48 sps:$4 sm:$0xff]   ;;  %v2772_v13 = vld [vmem:[%s3545_s1 + $0x6c] ss:$48 sps:$4 sm:$0xff]   ;;  %v2774_v14 = vld [vmem:[%s3545_s1 + $0x68] ss:$48 sps:$4 sm:$0xff]   ;;  %1058 = vmatprep.subr.bf16.mxu0 %v2769_v11 }
 0x182   : > { %1100 = vmatpush1.bf16.msra.mxu1 %v2768_v10  ;;  %v2775_v15 = vld [vmem:[%s3545_s1 + $0x64] ss:$48 sps:$4 sm:$0xff]   ;;  %1059 = vmatpush1.bf16.msra.mxu0 %v2771_v12  ;;  %v2777_v16 = vld [vmem:[%s3545_s1 + $0x60] ss:$48 sps:$4 sm:$0xff]   ;;  %v2778_v17 = vld [vmem:[%s3545_s1 + $0xcc] ss:$48 sps:$4 sm:$0xff]  }
 0x183   : > { %1101 = vmatprep.subr.bf16.mxu1 %v2772_v13  ;;  %1060 = vmatprep.subr.bf16.mxu0 %v2775_v15  ;;  %v2780_v18 = vld [vmem:[%s3545_s1 + $0xc8] ss:$48 sps:$4 sm:$0xff]   ;;  %v2781_v19 = vld [vmem:[%s3545_s1 + $0xc4] ss:$48 sps:$4 sm:$0xff]   ;;  %v2784_v20 = vld [vmem:[%s3545_s1 + $0x12c] ss:$48 sps:$4 sm:$0xff]  }
 0x184   : > { %v2783_v21 = vld [vmem:[%s3545_s1 + $0xc0] ss:$48 sps:$4 sm:$0xff]   ;;  %v2787_v22 = vld [vmem:[%s3545_s1 + $0x124] ss:$48 sps:$4 sm:$0xff]   ;;  %v2786_v23 = vld [vmem:[%s3545_s1 + $0x128] ss:$48 sps:$4 sm:$0xff]  }
 0x185   : > { %v2790_v24 = vld [vmem:[%s3545_s1 + $0x18c] ss:$48 sps:$4 sm:$0xff]   ;;  %v2789_v25 = vld [vmem:[%s3545_s1 + $0x120] ss:$48 sps:$4 sm:$0xff]   ;;  %v2793_v26 = vld [vmem:[%s3545_s1 + $0x184] ss:$48 sps:$4 sm:$0xff]  }
 0x186   : > { %1102 = vmatpush1.bf16.msra.mxu1 %v2774_v14  ;;  %1061 = vmatpush1.bf16.msra.mxu0 %v2777_v16  ;;  %v2792_v27 = vld [vmem:[%s3545_s1 + $0x188] ss:$48 sps:$4 sm:$0xff]   ;;  %v2796_v28 = vld [vmem:[%s3545_s1 + $0x1ec] ss:$48 sps:$4 sm:$0xff]   ;;  %v2795_v29 = vld [vmem:[%s3545_s1 + $0x180] ss:$48 sps:$4 sm:$0xff]  }
 0x187   : > { %1103 = vmatprep.subr.bf16.mxu1 %v2778_v17  ;;  %1062 = vmatprep.subr.bf16.mxu0 %v2781_v19  ;;  %v2799_v30 = vld [vmem:[%s3545_s1 + $0x1e4] ss:$48 sps:$4 sm:$0xff]   ;;  %v2798_v31 = vld [vmem:[%s3545_s1 + $0x1e8] ss:$48 sps:$4 sm:$0xff]   ;;  %v2802_v32 = vld [vmem:[%s3545_s1 + $0x24c] ss:$48 sps:$4 sm:$0xff]  }
 0x188   : > { %v2801_v33 = vld [vmem:[%s3545_s1 + $0x1e0] ss:$48 sps:$4 sm:$0xff]   ;;  %v2805_v34 = vld [vmem:[%s3545_s1 + $0x244] ss:$48 sps:$4 sm:$0xff]   ;;  %v2804_v35 = vld [vmem:[%s3545_s1 + $0x248] ss:$48 sps:$4 sm:$0xff]  }
 0x189   : > { %v2808_v36 = vld [vmem:[%s3545_s1 + $0x2ac] ss:$48 sps:$4 sm:$0xff]   ;;  %v2807_v37 = vld [vmem:[%s3545_s1 + $0x240] ss:$48 sps:$4 sm:$0xff]   ;;  %v2811_v38 = vld [vmem:[%s3545_s1 + $0x2a4] ss:$48 sps:$4 sm:$0xff]  }
 0x18a   : > { %1104 = vmatpush1.bf16.msra.mxu1 %v2780_v18  ;;  %1063 = vmatpush1.bf16.msra.mxu0 %v2783_v21  ;;  %v2810_v39 = vld [vmem:[%s3545_s1 + $0x2a8] ss:$48 sps:$4 sm:$0xff]   ;;  %v2814_v40 = vld [vmem:[%s3545_s1 + $0x30c] ss:$48 sps:$4 sm:$0xff]   ;;  %v2813_v41 = vld [vmem:[%s3545_s1 + $0x2a0] ss:$48 sps:$4 sm:$0xff]  }
 0x18b   : > { %1105 = vmatprep.subr.bf16.mxu1 %v2784_v20  ;;  %1064 = vmatprep.subr.bf16.mxu0 %v2787_v22  ;;  %v2817_v42 = vld [vmem:[%s3545_s1 + $0x304] ss:$48 sps:$4 sm:$0xff]   ;;  %v2816_v43 = vld [vmem:[%s3545_s1 + $0x308] ss:$48 sps:$4 sm:$0xff]   ;;  %v2820_v44 = vld [vmem:[%s3545_s1 + $0x36c] ss:$48 sps:$4 sm:$0xff]  }
 0x18c   : > { %v2819_v45 = vld [vmem:[%s3545_s1 + $0x300] ss:$48 sps:$4 sm:$0xff]   ;;  %v2823_v46 = vld [vmem:[%s3545_s1 + $0x364] ss:$48 sps:$4 sm:$0xff]   ;;  %v2822_v47 = vld [vmem:[%s3545_s1 + $0x368] ss:$48 sps:$4 sm:$0xff]  }
 0x18d   : > { %v2826_v48 = vld [vmem:[%s3545_s1 + $0x3cc] ss:$48 sps:$4 sm:$0xff]   ;;  %v2825_v49 = vld [vmem:[%s3545_s1 + $0x360] ss:$48 sps:$4 sm:$0xff]   ;;  %v2829_v50 = vld [vmem:[%s3545_s1 + $0x3c4] ss:$48 sps:$4 sm:$0xff]  }
 0x18e   : > { %1106 = vmatpush1.bf16.msra.mxu1 %v2786_v23  ;;  %1065 = vmatpush1.bf16.msra.mxu0 %v2789_v25  ;;  %v2828_v51 = vld [vmem:[%s3545_s1 + $0x3c8] ss:$48 sps:$4 sm:$0xff]   ;;  %v2832_v52 = vld [vmem:[%s3545_s1 + $0x42c] ss:$48 sps:$4 sm:$0xff]   ;;  %v2831_v53 = vld [vmem:[%s3545_s1 + $0x3c0] ss:$48 sps:$4 sm:$0xff]  }
 0x18f   : > { %1107 = vmatprep.subr.bf16.mxu1 %v2790_v24  ;;  %1066 = vmatprep.subr.bf16.mxu0 %v2793_v26  ;;  %v2835_v54 = vld [vmem:[%s3545_s1 + $0x424] ss:$48 sps:$4 sm:$0xff]   ;;  %v3601_v55 = vld [vmem:[#allocation2 + $0x8] sm:$0xff]  ;;  %v2837_v59 = vld [vmem:[%s3545_s1 + $0x420] ss:$48 sps:$4 sm:$0xff]   ;;  %vm3295_vm1 = vmmov 0  }
 0x190   : > { %v2834_v56 = vld [vmem:[%s3545_s1 + $0x428] ss:$48 sps:$4 sm:$0xff]   ;;  %v546_v57 = vpack.c.bf16 %v3601_v55, %v3601_v55  ;;  %v2838_v58 = vld [vmem:[%s3545_s1 + $0x48c] ss:$48 sps:$4 sm:$0xff]   ;;  %v2841_v60 = vld [vmem:[%s3545_s1 + $0x484] ss:$48 sps:$4 sm:$0xff]  }
 0x191   : > { %v2840_v61 = vld [vmem:[%s3545_s1 + $0x488] ss:$48 sps:$4 sm:$0xff]   ;;  %v2844_v62 = vld [vmem:[%s3545_s1 + $0x4ec] ss:$48 sps:$4 sm:$0xff]   ;;  %v2843_v63 = vld [vmem:[%s3545_s1 + $0x480] ss:$48 sps:$4 sm:$0xff]  }
 0x192   : > { %1108 = vmatpush1.bf16.msra.mxu1 %v2792_v27  ;;  %1067 = vmatpush1.bf16.msra.mxu0 %v2795_v29  ;;  %v2847_v0 = vld [vmem:[%s3545_s1 + $0x4e4] ss:$48 sps:$4 sm:$0xff]   ;;  %v2846_v1 = vld [vmem:[%s3545_s1 + $0x4e8] ss:$48 sps:$4 sm:$0xff]   ;;  %v2850_v2 = vld [vmem:[%s3545_s1 + $0x54c] ss:$48 sps:$4 sm:$0xff]  }
 0x193   : > { %1109 = vmatprep.subr.bf16.mxu1 %v2796_v28  ;;  %1068 = vmatprep.subr.bf16.mxu0 %v2799_v30  ;;  %v2849_v3 = vld [vmem:[%s3545_s1 + $0x4e0] ss:$48 sps:$4 sm:$0xff]   ;;  %v2853_v4 = vld [vmem:[%s3545_s1 + $0x544] ss:$48 sps:$4 sm:$0xff]   ;;  %v2852_v5 = vld [vmem:[%s3545_s1 + $0x548] ss:$48 sps:$4 sm:$0xff]  }
 0x194   : > { %1131 = vmatprep.mubr.bf16.mxu1 %v546_v57  ;;  %1090 = vmatprep.mubr.bf16.mxu0 %v546_v57  ;;  %v2856_v6 = vld [vmem:[%s3545_s1 + $0x5ac] ss:$48 sps:$4 sm:$0xff]   ;;  %v2855_v7 = vld [vmem:[%s3545_s1 + $0x540] ss:$48 sps:$4 sm:$0xff]   ;;  %v2858_v8 = vld [vmem:[%s3545_s1 + $0x5a8] ss:$48 sps:$4 sm:$0xff]  }
 0x195   : > { %v2859_v9 = vld [vmem:[%s3545_s1 + $0x5a4] ss:$48 sps:$4 sm:$0xff]   ;;  %v2861_v11 = vld [vmem:[%s3545_s1 + $0x5a0] ss:$48 sps:$4 sm:$0xff]   ;;  %vm1253_vm2 = vcmask 64512   ;;  %p2634_p4 = scmp.ne.s32.totalorder %s3347_s22, 1 }
 0x196   : > { %1110 = vmatpush1.bf16.msra.mxu1 %v2798_v31  ;;  %1069 = vmatpush1.bf16.msra.mxu0 %v2801_v33  ;;  %v3622_v10 = vld [vmem:[#allocation2] sm:$0xff] }
 0x197   : > { %1111 = vmatprep.subr.bf16.mxu1 %v2802_v32  ;;  %1070 = vmatprep.subr.bf16.mxu0 %v2805_v34  ;;  %v3627_v12 = vpack.c.bf16 %v3622_v10, %v3622_v10  ;;  %v2864_v13 = vld [vmem:[%s3545_s1 + $0x14] ss:$48 sps:$4 sm:$0xff]   ;;  %v2862_v14 = vld [vmem:[%s3545_s1 + $0x10] ss:$48 sps:$4 sm:$0xff]  }
 0x198   : > { %v2867_v15 = vld [vmem:[%s3545_s1 + $0x74] ss:$48 sps:$4 sm:$0xff]   ;;  %v2865_v16 = vld [vmem:[%s3545_s1 + $0x70] ss:$48 sps:$4 sm:$0xff]  }
 0x199   : > { %v2870_v17 = vld [vmem:[%s3545_s1 + $0xd4] ss:$48 sps:$4 sm:$0xff]   ;;  %v2868_v18 = vld [vmem:[%s3545_s1 + $0xd0] ss:$48 sps:$4 sm:$0xff]  }
 0x19a   : > { %1112 = vmatpush1.bf16.msra.mxu1 %v2804_v35  ;;  %1071 = vmatpush1.bf16.msra.mxu0 %v2807_v37  ;;  %v2873_v19 = vld [vmem:[%s3545_s1 + $0x134] ss:$48 sps:$4 sm:$0xff]   ;;  %v2871_v20 = vld [vmem:[%s3545_s1 + $0x130] ss:$48 sps:$4 sm:$0xff]  }
 0x19b   : > { %1113 = vmatprep.subr.bf16.mxu1 %v2808_v36  ;;  %1072 = vmatprep.subr.bf16.mxu0 %v2811_v38  ;;  %v2876_v21 = vld [vmem:[%s3545_s1 + $0x194] ss:$48 sps:$4 sm:$0xff]   ;;  %v2874_v22 = vld [vmem:[%s3545_s1 + $0x190] ss:$48 sps:$4 sm:$0xff]  }
 0x19c   : > { %v2879_v23 = vld [vmem:[%s3545_s1 + $0x1f4] ss:$48 sps:$4 sm:$0xff]   ;;  %v2877_v24 = vld [vmem:[%s3545_s1 + $0x1f0] ss:$48 sps:$4 sm:$0xff]  }
 0x19d   : > { %v2882_v25 = vld [vmem:[%s3545_s1 + $0x254] ss:$48 sps:$4 sm:$0xff]   ;;  %v2880_v26 = vld [vmem:[%s3545_s1 + $0x250] ss:$48 sps:$4 sm:$0xff]  }
 0x19e   : > { %1114 = vmatpush1.bf16.msra.mxu1 %v2810_v39  ;;  %1073 = vmatpush1.bf16.msra.mxu0 %v2813_v41  ;;  %v2885_v27 = vld [vmem:[%s3545_s1 + $0x2b4] ss:$48 sps:$4 sm:$0xff]   ;;  %v2883_v28 = vld [vmem:[%s3545_s1 + $0x2b0] ss:$48 sps:$4 sm:$0xff]  }
 0x19f   : > { %1115 = vmatprep.subr.bf16.mxu1 %v2814_v40  ;;  %1074 = vmatprep.subr.bf16.mxu0 %v2817_v42  ;;  %v2888_v29 = vld [vmem:[%s3545_s1 + $0x314] ss:$48 sps:$4 sm:$0xff]   ;;  %v2886_v30 = vld [vmem:[%s3545_s1 + $0x310] ss:$48 sps:$4 sm:$0xff]  }
 0x1a0   : > { %v2891_v31 = vld [vmem:[%s3545_s1 + $0x374] ss:$48 sps:$4 sm:$0xff]   ;;  %v2889_v32 = vld [vmem:[%s3545_s1 + $0x370] ss:$48 sps:$4 sm:$0xff]  }
 0x1a1   : > { %v2894_v33 = vld [vmem:[%s3545_s1 + $0x3d4] ss:$48 sps:$4 sm:$0xff]   ;;  %v2892_v34 = vld [vmem:[%s3545_s1 + $0x3d0] ss:$48 sps:$4 sm:$0xff]  }
 0x1a2   : > { %1116 = vmatpush1.bf16.msra.mxu1 %v2816_v43  ;;  %1075 = vmatpush1.bf16.msra.mxu0 %v2819_v45  ;;  %v2897_v35 = vld [vmem:[%s3545_s1 + $0x434] ss:$48 sps:$4 sm:$0xff]   ;;  %v2895_v36 = vld [vmem:[%s3545_s1 + $0x430] ss:$48 sps:$4 sm:$0xff]   ;;  %v3294_v45 = vmov 0.0  }
 0x1a3   : > { %1117 = vmatprep.subr.bf16.mxu1 %v2820_v44  ;;  %1076 = vmatprep.subr.bf16.mxu0 %v2823_v46  ;;  %v2900_v37 = vld [vmem:[%s3545_s1 + $0x494] ss:$48 sps:$4 sm:$0xff]   ;;  %v2898_v38 = vld [vmem:[%s3545_s1 + $0x490] ss:$48 sps:$4 sm:$0xff]   ;;  %v548_v46 = vlaneseq }
 0x1a4   : > { %v2903_v39 = vld [vmem:[%s3545_s1 + $0x4f4] ss:$48 sps:$4 sm:$0xff]   ;;  %v2901_v40 = vld [vmem:[%s3545_s1 + $0x4f0] ss:$48 sps:$4 sm:$0xff]  }
 0x1a5   : > { %v2906_v41 = vld [vmem:[%s3545_s1 + $0x554] ss:$48 sps:$4 sm:$0xff]   ;;  %v2904_v42 = vld [vmem:[%s3545_s1 + $0x550] ss:$48 sps:$4 sm:$0xff]  }
 0x1a6   : > { %1118 = vmatpush1.bf16.msra.mxu1 %v2822_v47  ;;  %1077 = vmatpush1.bf16.msra.mxu0 %v2825_v49  ;;  %v2909_v43 = vld [vmem:[%s3545_s1 + $0x5b4] ss:$48 sps:$4 sm:$0xff]   ;;  %v2907_v44 = vld [vmem:[%s3545_s1 + $0x5b0] ss:$48 sps:$4 sm:$0xff]   ;;  %v549_v47 = vshrl.u32 %v548_v46, 7 }
 0x1a7   : > { %1119 = vmatprep.subr.bf16.mxu1 %v2826_v48  ;;  %1078 = vmatprep.subr.bf16.mxu0 %v2829_v50  ;;  %v537_v49 = vld [vmem:[%s3551_s16] sm:$0x3f] }
 0x1a8   : > { %v558_v48 = vsub.s32 2, %v549_v47  ;;  %v562_v50 = vsub.s32 3, %v549_v47  ;;  %v2913_v46 = vld [vmem:[%s3545_s1 + $0x378] ss:$48 sps:$4 sm:$0xff]  }
 0x1aa   : > { %1120 = vmatpush1.bf16.msra.mxu1 %v2828_v51  ;;  %1079 = vmatpush1.bf16.msra.mxu0 %v2831_v53  ;;  %v3667_v51 = vsub.s32 0, %v549_v47  ;;  %v559_v53 = vrot.slane %v537_v49, %v558_v48  ;;  %v2918_v48 = vld [vmem:[%s3545_s1 + $0x3dc] ss:$48 sps:$4 sm:$0xff]  }
 0x1ab   : > { %1121 = vmatprep.subr.bf16.mxu1 %v2832_v52  ;;  %1080 = vmatprep.subr.bf16.mxu0 %v2835_v54  ;;  %v3669_v52 = vsub.s32 1, %v549_v47  ;;  %v563_v54 = vrot.slane %v537_v49, %v562_v50  ;;  %v2921_v50 = vld [vmem:[%s3545_s1 + $0x43c] ss:$48 sps:$4 sm:$0xff]  }
 0x1ae   : > { %1122 = vmatpush1.bf16.msra.mxu1 %v2834_v56  ;;  %1081 = vmatpush1.bf16.msra.mxu0 %v2837_v59  ;;  %v551_v56 = vrot.slane %v537_v49, %v3667_v51 }
 0x1af   : > { %1123 = vmatprep.subr.bf16.mxu1 %v2838_v58  ;;  %1082 = vmatprep.subr.bf16.mxu0 %v2841_v60  ;;  %v555_v58 = vrot.slane %v537_v49, %v3669_v52 }
 0x1b2   : > { %1124 = vmatpush1.bf16.msra.mxu1 %v2840_v61  ;;  %1083 = vmatpush1.bf16.msra.mxu0 %v2843_v63 }
 0x1b3   : > { %1125 = vmatprep.subr.bf16.mxu1 %v2844_v62  ;;  %1084 = vmatprep.subr.bf16.mxu0 %v2847_v0 }
 0x1b6   : > { %1126 = vmatpush1.bf16.msra.mxu1 %v2846_v1  ;;  %1085 = vmatpush1.bf16.msra.mxu0 %v2849_v3 }
 0x1b7   : > { %1127 = vmatprep.subr.bf16.mxu1 %v2850_v2  ;;  %1086 = vmatprep.subr.bf16.mxu0 %v2853_v4 }
 0x1ba   : > { %1128 = vmatpush1.bf16.msra.mxu1 %v2852_v5  ;;  %1087 = vmatpush1.bf16.msra.mxu0 %v2855_v7  ;;  %v570_v7 = vsub.s32 5, %v549_v47 }
 0x1bb   : > { %1129 = vmatprep.subr.bf16.mxu1 %v2856_v6  ;;  %1088 = vmatprep.subr.bf16.mxu0 %v2859_v9  ;;  %v566_v6 = vsub.s32 4, %v549_v47 }
 0x1bc   : > { %v571_v9 = vrot.slane %v537_v49, %v570_v7  ;;  %v2937_v7 = vld [vmem:[%s3545_s1 + $0x78] ss:$48 sps:$4 sm:$0xff]  }
 0x1be   : > { %1130 = vmatpush1.bf16.msra.mxu1 %v2858_v8  ;;  %1089 = vmatpush1.bf16.msra.mxu0 %v2861_v11  ;;  %v567_v8 = vrot.slane %v537_v49, %v566_v6  ;;  %v2916_v49 = vld [vmem:[%s3545_s1 + $0x3d8] ss:$48 sps:$4 sm:$0xff]  }
 0x1bf   : > { %1140 = vmatprep.subr.bf16.mxu0 %v2864_v13  ;;  %2657 = vmatprep.subr.mxu1 %v3294_v45 }
 0x1c1   : > { %1132 = vmatmul.mubr.bf16.vlgmr.msra.gmra.mrb[0].mxu1 %v3627_v12  ;;  %1091 = vmatmul.mubr.bf16.vlgmr.msra.gmra.mrb[0].mxu0 %v3627_v12 }
 0x1c2   : > { %1141 = vmatpush1.bf16.msra.mxu0 %v2862_v14  ;;  %1172 = vmatprep.mubr.bf16.mxu0 %v546_v57 }
 0x1c3   : > { %1142 = vmatprep.subr.bf16.mxu0 %v2867_v15  ;;  %2659 = vmatprep.mubr.msk.f32.mxu1 %vm3295_vm1, %v3294_v45 }
 0x1c6   : > { %1143 = vmatpush1.bf16.msra.mxu0 %v2865_v16 }
 0x1c7   : > { %1144 = vmatprep.subr.bf16.mxu0 %v2870_v17 }
 0x1ca   : > { %1145 = vmatpush1.bf16.msra.mxu0 %v2868_v18 }
 0x1cb   : > { %1146 = vmatprep.subr.bf16.mxu0 %v2873_v19 }
 0x1ce   : > { %1147 = vmatpush1.bf16.msra.mxu0 %v2871_v20  ;;  %v376_v20 = vld [vmem:[#allocation7] sm:$0xff] }
 0x1cf   : > { %1148 = vmatprep.subr.bf16.mxu0 %v2876_v21 }
 0x1d2   : > { %1149 = vmatpush1.bf16.msra.mxu0 %v2874_v22 }
 0x1d3   : > { %1150 = vmatprep.subr.bf16.mxu0 %v2879_v23 }
 0x1d6   : > { %1151 = vmatpush1.bf16.msra.mxu0 %v2877_v24 }
 0x1d7   : > { %1152 = vmatprep.subr.bf16.mxu0 %v2882_v25 }
 0x1da   : > { %1153 = vmatpush1.bf16.msra.mxu0 %v2880_v26 }
 0x1db   : > { %1154 = vmatprep.subr.bf16.mxu0 %v2885_v27 }
 0x1de   : > { %1155 = vmatpush1.bf16.msra.mxu0 %v2883_v28 }
 0x1df   : > { %1156 = vmatprep.subr.bf16.mxu0 %v2888_v29 }
 0x1e2   : > { %1157 = vmatpush1.bf16.msra.mxu0 %v2886_v30 }
 0x1e3   : > { %1158 = vmatprep.subr.bf16.mxu0 %v2891_v31 }
 0x1e6   : > { %1159 = vmatpush1.bf16.msra.mxu0 %v2889_v32 }
 0x1e7   : > { %1160 = vmatprep.subr.bf16.mxu0 %v2894_v33 }
 0x1ea   : > { %1161 = vmatpush1.bf16.msra.mxu0 %v2892_v34 }
 0x1eb   : > { %1162 = vmatprep.subr.bf16.mxu0 %v2897_v35 }
 0x1ee   : > { %1163 = vmatpush1.bf16.msra.mxu0 %v2895_v36 }
 0x1ef   : > { %1164 = vmatprep.subr.bf16.mxu0 %v2900_v37 }
 0x1f2   : > { %1165 = vmatpush1.bf16.msra.mxu0 %v2898_v38  ;;  %v2912_v38 = vld [vmem:[%s3545_s1 + $0x31c] ss:$48 sps:$4 sm:$0xff]  }
 0x1f3   : > { %1166 = vmatprep.subr.bf16.mxu0 %v2903_v39 }
 0x1f6   : > { %1167 = vmatpush1.bf16.msra.mxu0 %v2901_v40 }
 0x1f7   : > { %1168 = vmatprep.subr.bf16.mxu0 %v2906_v41 }
 0x1fa   : > { %1169 = vmatpush1.bf16.msra.mxu0 %v2904_v42  ;;  %v2910_v42 = vld [vmem:[%s3545_s1 + $0x318] ss:$48 sps:$4 sm:$0xff]  }
 0x1fb   : > { %1170 = vmatprep.subr.bf16.mxu0 %v2909_v43 }
 0x1fe   : > { %1171 = vmatpush1.bf16.msra.mxu0 %v2907_v44  ;;  %v2915_v44 = vld [vmem:[%s3545_s1 + $0x37c] ss:$48 sps:$4 sm:$0xff]  }
 0x1ff   : > { %2647 = vmatprep.subr.mxu0 %v3294_v45 }
 0x201   : > { %1173 = vmatmul.mubr.bf16.vlgmr.msra.gmra.mrb[4].mxu0 %v3627_v12 }
 0x202   : > { %2649 = vmatprep.mubr.msk.f32.mxu0 %vm3295_vm1, %v3294_v45 }
 0x294   : > { %v1133_v57 = vpop.f32.mrb[0].mxu1  ;;  %v1092_v63 = vpop.f32.mrb[0].mxu0 }
 0x295   : > { %v1134_v59 = vadd.f32 %v1133_v57, %v559_v53  ;;  %v1135_v60 = vpop.f32.mrb[1].mxu1  ;;  %v1093_v0 = vadd.f32 %v1092_v63, %v551_v56  ;;  %v1094_v2 = vpop.f32.mrb[1].mxu0  ;;  %v2919_v53 = vld [vmem:[%s3545_s1 + $0x438] ss:$48 sps:$4 sm:$0xff]   ;;  %v2927_v57 = vld [vmem:[%s3545_s1 + $0x4fc] ss:$48 sps:$4 sm:$0xff]  }
 0x296   : > { %v1136_v61 = vadd.f32 %v1135_v60, %v563_v54  ;;  %v1137_v62 = vpop.f32.mrb[2].mxu1  ;;  %v1095_v3 = vadd.f32 %v1094_v2, %v555_v58  ;;  %v1096_v4 = vpop.f32.mrb[2].mxu0  ;;  %v2924_v54 = vld [vmem:[%s3545_s1 + $0x49c] ss:$48 sps:$4 sm:$0xff]   ;;  %v2922_v56 = vld [vmem:[%s3545_s1 + $0x498] ss:$48 sps:$4 sm:$0xff]  }
 0x297   : > { %v1138_v1 = vpop.f32.mrb[3].mxu1  ;;  %2648 = vmatpush3.xpose.msra.mxu0 %v1134_v59  ;;  %v1097_v5 = vpop.f32.mrb[3].mxu0  ;;  %v2925_v58 = vld [vmem:[%s3545_s1 + $0x4f8] ss:$48 sps:$4 sm:$0xff]   ;;  %v2930_v59 = vld [vmem:[%s3545_s1 + $0x55c] ss:$48 sps:$4 sm:$0xff]  }
 0x298   : > { %2658 = vmatpush3.xpose.msra.mxu1 %v1136_v61  ;;  %2652 = vmatprep.subr.mxu0 %v3294_v45  ;;  %v2928_v60 = vld [vmem:[%s3545_s1 + $0x558] ss:$48 sps:$4 sm:$0xff]   ;;  %v2933_v61 = vld [vmem:[%s3545_s1 + $0x5bc] ss:$48 sps:$4 sm:$0xff]  }
 0x299   : > { %2662 = vmatprep.subr.mxu1 %v3294_v45  ;;  %v2931_v62 = vld [vmem:[%s3545_s1 + $0x5b8] ss:$48 sps:$4 sm:$0xff]   ;;  %v2936_v63 = vld [vmem:[%s3545_s1 + $0x1c] ss:$48 sps:$4 sm:$0xff]  }
 0x29a   : > { %2650 = vmatmul.mubr.f32.vlgmr.msra.gmra.mrb[8].mxu0 %v1093_v0  ;;  %v3296_v0 = vmov 0   ;;  %v2934_v2 = vld [vmem:[%s3545_s1 + $0x18] ss:$48 sps:$4 sm:$0xff]   ;;  %v2939_v5 = vld [vmem:[%s3545_s1 + $0x7c] ss:$48 sps:$4 sm:$0xff]  }
 0x29b   : > { %2660 = vmatmul.mubr.f32.vlgmr.msra.gmra.mrb[4].mxu1 %v1095_v3  ;;  %2654 = vmatprep.mubr.msk.f32.mxu0 %vm3295_vm1, %v3294_v45 }
 0x29c   : > { %2664 = vmatprep.mubr.msk.f32.mxu1 %vm3295_vm1, %v3294_v45 }
 0x2d4   : > { %v1174_v11 = vpop.f32.mrb[4].mxu0 }
 0x2d5   : > { %v1175_v12 = vadd.f32 %v1174_v11, %v567_v8  ;;  %v1176_v13 = vpop.f32.mrb[5].mxu0  ;;  %v2940_v11 = vld [vmem:[%s3545_s1 + $0xd8] ss:$48 sps:$4 sm:$0xff]  }
 0x2d6   : > { %v1177_v14 = vadd.f32 %v1176_v13, %v571_v9  ;;  %v1178_v15 = vpop.f32.mrb[6].mxu0  ;;  %v2942_v9 = vld [vmem:[%s3545_s1 + $0xdc] ss:$48 sps:$4 sm:$0xff]   ;;  %v2943_v13 = vld [vmem:[%s3545_s1 + $0x138] ss:$48 sps:$4 sm:$0xff]  }
 0x2d7   : > { %v1179_v16 = vpop.f32.mrb[7].mxu0  ;;  %2653 = vmatpush3.msra.mxu0 %v1175_v12  ;;  %v2945_v12 = vld [vmem:[%s3545_s1 + $0x13c] ss:$48 sps:$4 sm:$0xff]   ;;  %v2946_v15 = vld [vmem:[%s3545_s1 + $0x198] ss:$48 sps:$4 sm:$0xff]  }
 0x2d8   : > { %2663 = vmatpush3.msra.mxu1 %v1177_v14  ;;  %v2948_v14 = vld [vmem:[%s3545_s1 + $0x19c] ss:$48 sps:$4 sm:$0xff]  }
 0x2d9   : > { %1608 = vmatprep.subr.bf16.mxu1 %v2912_v38  ;;  %v2951_v16 = vld [vmem:[%s3545_s1 + $0x1fc] ss:$48 sps:$4 sm:$0xff]  }
 0x36d   : > { %v1247_v17 = vpop.f32.mrb[8].mxu0 }
 0x36e   : > { %v1421_v18 = vpop.f32.mrb[4].mxu1  ;;  %v2651_v19 = vpop.f32.mrb[9].mxu0  ;;  %v1251_v22 = vmul.f32 0.088388346, %v1247_v17  ;;  %v2949_v17 = vld [vmem:[%s3545_s1 + $0x1f8] ss:$48 sps:$4 sm:$0xff]  }
 0x36f   : > { %v1425_v21 = vmul.f32 0.088388346, %v1421_v18  ;;  %v2661_v23 = vpop.f32.mrb[5].mxu1  ;;  %v2954_v18 = vld [vmem:[%s3545_s1 + $0x25c] ss:$48 sps:$4 sm:$0xff]  }
 0x370   : > { %v1252_v26 = vadd.f32 %v1251_v22, %v376_v20  ;;  %v2952_v19 = vld [vmem:[%s3545_s1 + $0x258] ss:$48 sps:$4 sm:$0xff]  }
 0x371   : > { %v1426_v24 = vadd.f32 %v1425_v21, %v376_v20  ;;  %v2957_v20 = vld [vmem:[%s3545_s1 + $0x2bc] ss:$48 sps:$4 sm:$0xff]   ;;  %v2955_v21 = vld [vmem:[%s3545_s1 + $0x2b8] ss:$48 sps:$4 sm:$0xff]  }
 0x372   : > { %v1254_v27 = vsel %vm1253_vm2, %v1252_v26, -inf }
 0x373   : > { %v1427_v25 = vsel %vm1253_vm2, %v1426_v24, -inf }
 0x374   : > { %1428 = vmax.xlane.f32.xlu0 %v1427_v25 }
 0x378   : > { %1255 = vmax.xlane.f32.xlu0 %v1254_v27  ;;  %v538_v27 = vld [vmem:[%s3551_s16 + $0x6] sm:$0x3] }
 0x401   : > { %v1429_v28 = vpop.xlane.xlu0 %1428 }
 0x402   : > { %v1430_v29 = vsub.f32 %v1426_v24, %v1429_v28  ;;  %v1774_v28 = vrot.slane %v538_v27, %v3667_v51 }
 0x404   : > { %v1431_v30 = vmul.f32 1.442695, %v1430_v29 }
 0x405   : > { %v1256_v31 = vpop.xlane.xlu0 %1255 }
 0x406   : > { %3054 = vpow2.f32 %v1431_v30  ;;  %v1257_v32 = vsub.f32 %v1252_v26, %v1256_v31  ;;  %v1778_v30 = vrot.slane %v538_v27, %v3669_v52  ;;  %v3018_v27 = vld [vmem:[%s3545_s1 + $0x1a8] ss:$48 sps:$4 sm:$0xff]  }
 0x408   : > { %v1258_v33 = vmul.f32 1.442695, %v1257_v32 }
 0x40a   : > { %3056 = vpow2.f32 %v1258_v33 }
 0x410   : > { %v3055_v34 = vpop.eup %3054 }
 0x411   : > { %v1433_v35 = vsel %vm1253_vm2, %v3055_v34, 0.0 }
 0x412   : > { %1434 = vadd.xlane.f32.xlu1 %v1433_v35 }
 0x414   : > { %v3057_v36 = vpop.eup %3056 }
 0x415   : > { %v1260_v37 = vsel %vm1253_vm2, %v3057_v36, 0.0 }
 0x416   : > { %1261 = vadd.xlane.f32.xlu1 %v1260_v37 }
 0x49f   : > { %v1435_v39 = vpop.xlane.xlu1 %1434 }
 0x4a0   : > { %3058 = vrcp.f32 %v1435_v39 }
 0x4a3   : > { %v1262_v40 = vpop.xlane.xlu1 %1261 }
 0x4a4   : > { %3060 = vrcp.f32 %v1262_v40 }
 0x4aa   : > { %v3059_v41 = vpop.eup %3058 }
 0x4ab   : > { %v1437_v43 = vmul.f32 %v3059_v41, %v3055_v34  ;;  %v2958_v41 = vld [vmem:[%s3545_s1 + $0x20] ss:$48 sps:$4 sm:$0xff]  }
 0x4ad   : > { %2665 = vmatmul.mubr.msk.f32.vlgmr.msra.gmra.mrb[6].mxu1 %vm1253_vm2, %v1437_v43  ;;  %v2963_v43 = vld [vmem:[%s3545_s1 + $0x84] ss:$48 sps:$4 sm:$0xff]  }
 0x4ae   : > { %v3061_v45 = vpop.eup %3060  ;;  %1609 = vmatpush1.bf16.msra.mxu1 %v2910_v42  ;;  %1640 = vmatprep.mubr.bf16.mxu1 %v3296_v0  ;;  %v2960_v42 = vld [vmem:[%s3545_s1 + $0x24] ss:$48 sps:$4 sm:$0xff]  }
 0x4af   : > { %v1264_v47 = vmul.f32 %v3061_v45, %v3057_v36  ;;  %1610 = vmatprep.subr.bf16.mxu1 %v2915_v44  ;;  %2001 = vmatprep.subr.bf16.mxu0 %v2960_v42  ;;  %v2961_v44 = vld [vmem:[%s3545_s1 + $0x80] ss:$48 sps:$4 sm:$0xff]   ;;  %v2966_v45 = vld [vmem:[%s3545_s1 + $0xe4] ss:$48 sps:$4 sm:$0xff]   ;;  %v3044_v42 = vld [vmem:[%s3545_s1 + $0x4ac] ss:$48 sps:$4 sm:$0xff]  }
 0x4b1   : > { %2655 = vmatmul.mubr.msk.f32.vlgmr.msra.gmra.mrb[10].mxu0 %vm1253_vm2, %v1264_v47  ;;  %v2972_v47 = vld [vmem:[%s3545_s1 + $0x1a4] ss:$48 sps:$4 sm:$0xff]  }
 0x4b2   : > { %1611 = vmatpush1.bf16.msra.mxu1 %v2913_v46  ;;  %2002 = vmatpush1.bf16.msra.mxu0 %v2958_v41  ;;  %v2967_v46 = vld [vmem:[%s3545_s1 + $0x140] ss:$48 sps:$4 sm:$0xff]   ;;  %v3039_v41 = vld [vmem:[%s3545_s1 + $0x448] ss:$48 sps:$4 sm:$0xff]  }
 0x4b3   : > { %1612 = vmatprep.subr.bf16.mxu1 %v2918_v48  ;;  %2003 = vmatprep.subr.bf16.mxu0 %v2963_v43  ;;  %v2970_v48 = vld [vmem:[%s3545_s1 + $0x1a0] ss:$48 sps:$4 sm:$0xff]   ;;  %v3042_v43 = vld [vmem:[%s3545_s1 + $0x4a8] ss:$48 sps:$4 sm:$0xff]  }
 0x4b6   : > { %1613 = vmatpush1.bf16.msra.mxu1 %v2916_v49  ;;  %2004 = vmatpush1.bf16.msra.mxu0 %v2961_v44  ;;  %v2975_v49 = vld [vmem:[%s3545_s1 + $0x204] ss:$48 sps:$4 sm:$0xff]   ;;  %v3047_v44 = vld [vmem:[%s3545_s1 + $0x50c] ss:$48 sps:$4 sm:$0xff]  }
 0x4b7   : > { %1614 = vmatprep.subr.bf16.mxu1 %v2921_v50  ;;  %2005 = vmatprep.subr.bf16.mxu0 %v2966_v45  ;;  %v2973_v50 = vld [vmem:[%s3545_s1 + $0x200] ss:$48 sps:$4 sm:$0xff]   ;;  %v3045_v45 = vld [vmem:[%s3545_s1 + $0x508] ss:$48 sps:$4 sm:$0xff]  }
 0x4ba   : > { %1615 = vmatpush1.bf16.msra.mxu1 %v2919_v53  ;;  %v2978_v53 = vld [vmem:[%s3545_s1 + $0x264] ss:$48 sps:$4 sm:$0xff]  }
 0x4bb   : > { %1616 = vmatprep.subr.bf16.mxu1 %v2924_v54  ;;  %v2976_v54 = vld [vmem:[%s3545_s1 + $0x260] ss:$48 sps:$4 sm:$0xff]  }
 0x4be   : > { %1617 = vmatpush1.bf16.msra.mxu1 %v2922_v56  ;;  %v2981_v56 = vld [vmem:[%s3545_s1 + $0x2c4] ss:$48 sps:$4 sm:$0xff]  }
 0x4bf   : > { %1618 = vmatprep.subr.bf16.mxu1 %v2927_v57  ;;  %v2979_v57 = vld [vmem:[%s3545_s1 + $0x2c0] ss:$48 sps:$4 sm:$0xff]  }
 0x4c2   : > { %1619 = vmatpush1.bf16.msra.mxu1 %v2925_v58  ;;  %v2984_v58 = vld [vmem:[%s3545_s1 + $0x324] ss:$48 sps:$4 sm:$0xff]  }
 0x4c3   : > { %1620 = vmatprep.subr.bf16.mxu1 %v2930_v59  ;;  %v2982_v59 = vld [vmem:[%s3545_s1 + $0x320] ss:$48 sps:$4 sm:$0xff]  }
 0x4c6   : > { %1621 = vmatpush1.bf16.msra.mxu1 %v2928_v60  ;;  %v2987_v60 = vld [vmem:[%s3545_s1 + $0x384] ss:$48 sps:$4 sm:$0xff]  }
 0x4c7   : > { %1622 = vmatprep.subr.bf16.mxu1 %v2933_v61  ;;  %v2985_v61 = vld [vmem:[%s3545_s1 + $0x380] ss:$48 sps:$4 sm:$0xff]  }
 0x4ca   : > { %1623 = vmatpush1.bf16.msra.mxu1 %v2931_v62 }
 0x4cb   : > { %1729 = vmatprep.subr.bf16.mxu1 %v2936_v63 }
 0x580   : > { %v1507_v1 = vpop.f32.mrb[6].mxu1 }
 0x581   : > { %v1527_v3 = vpack.c.bf16 %v1507_v1, %v1507_v1  ;;  %v2666_v4 = vpop.f32.mrb[7].mxu1 }
 0x583   : > { %1641 = vmatmul.mubr.bf16.vlgmr.msra.gmra.mrb[8].mxu1 %v1527_v3 }
 0x584   : > { %1730 = vmatpush1.bf16.msra.mxu1 %v2934_v2  ;;  %v1334_v6 = vpop.f32.mrb[10].mxu0  ;;  %1761 = vmatprep.mubr.bf16.mxu1 %v3296_v0 }
 0x585   : > { %v2656_v8 = vpop.f32.mrb[11].mxu0  ;;  %1731 = vmatprep.subr.bf16.mxu1 %v2939_v5  ;;  %v1354_v22 = vpack.c.bf16 %v1334_v6, %v1334_v6  ;;  %v2990_v5 = vld [vmem:[%s3545_s1 + $0x3e4] ss:$48 sps:$4 sm:$0xff]   ;;  %v2988_v6 = vld [vmem:[%s3545_s1 + $0x3e0] ss:$48 sps:$4 sm:$0xff]  }
 0x586   : > { %v2991_v8 = vld [vmem:[%s3545_s1 + $0x440] ss:$48 sps:$4 sm:$0xff]  }
 0x588   : > { %1732 = vmatpush1.bf16.msra.mxu1 %v2937_v7  ;;  %v2993_v7 = vld [vmem:[%s3545_s1 + $0x444] ss:$48 sps:$4 sm:$0xff]  }
 0x589   : > { %1733 = vmatprep.subr.bf16.mxu1 %v2942_v9  ;;  %v2996_v9 = vld [vmem:[%s3545_s1 + $0x4a4] ss:$48 sps:$4 sm:$0xff]  }
 0x58c   : > { %1734 = vmatpush1.bf16.msra.mxu1 %v2940_v11  ;;  %v2994_v11 = vld [vmem:[%s3545_s1 + $0x4a0] ss:$48 sps:$4 sm:$0xff]  }
 0x58d   : > { %1735 = vmatprep.subr.bf16.mxu1 %v2945_v12  ;;  %v2999_v12 = vld [vmem:[%s3545_s1 + $0x504] ss:$48 sps:$4 sm:$0xff]  }
 0x590   : > { %1736 = vmatpush1.bf16.msra.mxu1 %v2943_v13  ;;  %v2997_v13 = vld [vmem:[%s3545_s1 + $0x500] ss:$48 sps:$4 sm:$0xff]  }
 0x591   : > { %1737 = vmatprep.subr.bf16.mxu1 %v2948_v14  ;;  %v3000_v14 = vld [vmem:[%s3545_s1 + $0x560] ss:$48 sps:$4 sm:$0xff]  }
 0x594   : > { %1738 = vmatpush1.bf16.msra.mxu1 %v2946_v15  ;;  %v3002_v15 = vld [vmem:[%s3545_s1 + $0x564] ss:$48 sps:$4 sm:$0xff]  }
 0x595   : > { %1739 = vmatprep.subr.bf16.mxu1 %v2951_v16  ;;  %v3005_v16 = vld [vmem:[%s3545_s1 + $0x5c4] ss:$48 sps:$4 sm:$0xff]  }
 0x598   : > { %1740 = vmatpush1.bf16.msra.mxu1 %v2949_v17  ;;  %v3003_v17 = vld [vmem:[%s3545_s1 + $0x5c0] ss:$48 sps:$4 sm:$0xff]  }
 0x599   : > { %1741 = vmatprep.subr.bf16.mxu1 %v2954_v18  ;;  %v3006_v18 = vld [vmem:[%s3545_s1 + $0x28] ss:$48 sps:$4 sm:$0xff]  }
 0x59c   : > { %1742 = vmatpush1.bf16.msra.mxu1 %v2952_v19  ;;  %v3008_v19 = vld [vmem:[%s3545_s1 + $0x2c] ss:$48 sps:$4 sm:$0xff]  }
 0x59d   : > { %1743 = vmatprep.subr.bf16.mxu1 %v2957_v20  ;;  %v3011_v20 = vld [vmem:[%s3545_s1 + $0x8c] ss:$48 sps:$4 sm:$0xff]  }
 0x5a0   : > { %1744 = vmatpush1.bf16.msra.mxu1 %v2955_v21  ;;  %v3009_v21 = vld [vmem:[%s3545_s1 + $0x88] ss:$48 sps:$4 sm:$0xff]  }
 0x5a1   : > { %2217 = vmatprep.subr.bf16.mxu1 %v3008_v19  ;;  %v542_v19 = vld [vmem:[%s3551_s16 + $0xe] sm:$0x3] }
 0x5a3   : > { %1762 = vmatmul.mubr.bf16.vlgmr.msra.gmra.mrb[12].mxu1 %v1354_v22  ;;  %v3014_v22 = vld [vmem:[%s3545_s1 + $0xec] ss:$48 sps:$4 sm:$0xff]  }
 0x5a4   : > { %2218 = vmatpush1.bf16.msra.mxu1 %v3006_v18 }
 0x5a5   : > { %2219 = vmatprep.subr.bf16.mxu1 %v3011_v20  ;;  %v2050_v20 = vrot.slane %v542_v19, %v3667_v51 }
 0x5a8   : > { %2220 = vmatpush1.bf16.msra.mxu1 %v3009_v21  ;;  %v2054_v21 = vrot.slane %v542_v19, %v3669_v52 }
 0x5a9   : > { %2221 = vmatprep.subr.bf16.mxu1 %v3014_v22 }
 0x656   : > { %v1642_v23 = vpop.f32.mrb[8].mxu1 }
 0x657   : > { %v1644_v24 = vpop.f32.mrb[9].mxu1 }
 0x658   : > { %v1646_v25 = vpop.f32.mrb[10].mxu1 }
 0x659   : > { %v1647_v26 = vpop.f32.mrb[11].mxu1  ;;  %v3015_v25 = vld [vmem:[%s3545_s1 + $0x148] ss:$48 sps:$4 sm:$0xff]  }
 0x65a   : > { %v3020_v26 = vld [vmem:[%s3545_s1 + $0x1ac] ss:$48 sps:$4 sm:$0xff]  }
 0x676   : > { %v1763_v29 = vpop.f32.mrb[12].mxu1 }
 0x677   : > { %v1764_v31 = vadd.f32 %v1763_v29, %v1642_v23  ;;  %v1765_v32 = vpop.f32.mrb[13].mxu1  ;;  %v3012_v23 = vld [vmem:[%s3545_s1 + $0xe8] ss:$48 sps:$4 sm:$0xff]  }
 0x678   : > { %v1766_v33 = vadd.f32 %v1765_v32, %v1644_v24  ;;  %v1767_v34 = vpop.f32.mrb[14].mxu1  ;;  %v3017_v24 = vld [vmem:[%s3545_s1 + $0x14c] ss:$48 sps:$4 sm:$0xff]   ;;  %2222 = vmatpush1.bf16.msra.mxu1 %v3012_v23  ;;  %v3021_v29 = vld [vmem:[%s3545_s1 + $0x208] ss:$48 sps:$4 sm:$0xff]  }
 0x679   : > { %v1781_v35 = vadd.f32 %v1774_v28, %v1764_v31  ;;  %v1768_v36 = vpop.f32.mrb[15].mxu1  ;;  %2223 = vmatprep.subr.bf16.mxu1 %v3017_v24  ;;  %v3023_v28 = vld [vmem:[%s3545_s1 + $0x20c] ss:$48 sps:$4 sm:$0xff]   ;;  %v3024_v31 = vld [vmem:[%s3545_s1 + $0x268] ss:$48 sps:$4 sm:$0xff]  }
 0x67a   : > { %v1782_v37 = vadd.f32 %v1778_v30, %v1766_v33  ;;  %v3026_v30 = vld [vmem:[%s3545_s1 + $0x26c] ss:$48 sps:$4 sm:$0xff]   ;;  %v3027_v33 = vld [vmem:[%s3545_s1 + $0x2c8] ss:$48 sps:$4 sm:$0xff]  }
 0x67b   : > { %v1783_v38 = vadd.f32 %v1781_v35, %v3622_v10  ;;  %v2964_v10 = vld [vmem:[%s3545_s1 + $0xe0] ss:$48 sps:$4 sm:$0xff]   ;;  %v3029_v32 = vld [vmem:[%s3545_s1 + $0x2cc] ss:$48 sps:$4 sm:$0xff]   ;;  %v3030_v35 = vld [vmem:[%s3545_s1 + $0x328] ss:$48 sps:$4 sm:$0xff]  }
 0x67c   : > { %v1784_v39 = vadd.f32 %v1782_v37, %v3601_v55  ;;  %v2969_v55 = vld [vmem:[%s3545_s1 + $0x144] ss:$48 sps:$4 sm:$0xff]   ;;  %2006 = vmatpush1.bf16.msra.mxu0 %v2964_v10  ;;  %2224 = vmatpush1.bf16.msra.mxu1 %v3015_v25  ;;  %v3032_v34 = vld [vmem:[%s3545_s1 + $0x32c] ss:$48 sps:$4 sm:$0xff]   ;;  %v3033_v37 = vld [vmem:[%s3545_s1 + $0x388] ss:$48 sps:$4 sm:$0xff]  }
 0x67d   : > { %2007 = vmatprep.subr.bf16.mxu0 %v2969_v55  ;;  %2225 = vmatprep.subr.bf16.mxu1 %v3020_v26  ;;  %v3035_v36 = vld [vmem:[%s3545_s1 + $0x38c] ss:$48 sps:$4 sm:$0xff]  }
 0x67e   : > { %v1785_v40 = vadd.f32 %v1784_v39, %v1783_v38 }
 0x680   : > { %1786 = vadd.xlane.f32.xlu0 %v1785_v40  ;;  %2008 = vmatpush1.bf16.msra.mxu0 %v2967_v46  ;;  %v3041_v40 = vld [vmem:[%s3545_s1 + $0x44c] ss:$48 sps:$4 sm:$0xff]  }
 0x681   : > { %2009 = vmatprep.subr.bf16.mxu0 %v2972_v47  ;;  %2226 = vmatpush1.bf16.msra.mxu1 %v3018_v27  ;;  %v539_v47 = vld [vmem:[%s3551_s16 + $0x8] sm:$0x3] }
 0x682   : > { %2227 = vmatprep.subr.bf16.mxu1 %v3023_v28 }
 0x684   : > { %2010 = vmatpush1.bf16.msra.mxu0 %v2970_v48  ;;  %v540_v48 = vld [vmem:[%s3551_s16 + $0xa] sm:$0x3] }
 0x685   : > { %2011 = vmatprep.subr.bf16.mxu0 %v2975_v49  ;;  %2228 = vmatpush1.bf16.msra.mxu1 %v3021_v29  ;;  %v1806_v49 = vrot.slane %v539_v47, %v3667_v51 }
 0x686   : > { %2229 = vmatprep.subr.bf16.mxu1 %v3026_v30 }
 0x688   : > { %2012 = vmatpush1.bf16.msra.mxu0 %v2973_v50  ;;  %v1810_v50 = vrot.slane %v539_v47, %v3669_v52 }
 0x689   : > { %2013 = vmatprep.subr.bf16.mxu0 %v2978_v53  ;;  %2230 = vmatpush1.bf16.msra.mxu1 %v3024_v31 }
 0x68a   : > { %2231 = vmatprep.subr.bf16.mxu1 %v3029_v32 }
 0x68c   : > { %2014 = vmatpush1.bf16.msra.mxu0 %v2976_v54 }
 0x68d   : > { %2015 = vmatprep.subr.bf16.mxu0 %v2981_v56  ;;  %2232 = vmatpush1.bf16.msra.mxu1 %v3027_v33 }
 0x68e   : > { %2233 = vmatprep.subr.bf16.mxu1 %v3032_v34 }
 0x690   : > { %2016 = vmatpush1.bf16.msra.mxu0 %v2979_v57  ;;  %v1819_v57 = vrot.slane %v540_v48, %v3667_v51 }
 0x691   : > { %2017 = vmatprep.subr.bf16.mxu0 %v2984_v58  ;;  %2234 = vmatpush1.bf16.msra.mxu1 %v3030_v35  ;;  %v1823_v58 = vrot.slane %v540_v48, %v3669_v52 }
 0x692   : > { %2235 = vmatprep.subr.bf16.mxu1 %v3035_v36 }
 0x694   : > { %2018 = vmatpush1.bf16.msra.mxu0 %v2982_v59 }
 0x695   : > { %2019 = vmatprep.subr.bf16.mxu0 %v2987_v60  ;;  %2236 = vmatpush1.bf16.msra.mxu1 %v3033_v37 }
 0x698   : > { %2020 = vmatpush1.bf16.msra.mxu0 %v2985_v61 }
 0x699   : > { %2021 = vmatprep.subr.bf16.mxu0 %v2990_v5  ;;  %v541_v5 = vld [vmem:[%s3551_s16 + $0xc] sm:$0x3] }
 0x69c   : > { %2022 = vmatpush1.bf16.msra.mxu0 %v2988_v6  ;;  %v1834_v6 = vrot.slane %v541_v5, %v3667_v51 }
 0x69d   : > { %2023 = vmatprep.subr.bf16.mxu0 %v2993_v7  ;;  %v1838_v7 = vrot.slane %v541_v5, %v3669_v52 }
 0x6a0   : > { %2024 = vmatpush1.bf16.msra.mxu0 %v2991_v8 }
 0x6a1   : > { %2025 = vmatprep.subr.bf16.mxu0 %v2996_v9 }
 0x6a4   : > { %2026 = vmatpush1.bf16.msra.mxu0 %v2994_v11 }
 0x6a5   : > { %2027 = vmatprep.subr.bf16.mxu0 %v2999_v12 }
 0x6a8   : > { %2028 = vmatpush1.bf16.msra.mxu0 %v2997_v13 }
 0x6a9   : > { %2029 = vmatprep.subr.bf16.mxu0 %v3002_v15 }
 0x6ac   : > { %2030 = vmatpush1.bf16.msra.mxu0 %v3000_v14 }
 0x6ad   : > { %2031 = vmatprep.subr.bf16.mxu0 %v3005_v16 }
 0x6b0   : > { %2032 = vmatpush1.bf16.msra.mxu0 %v3003_v17 }
 0x70d   : > { %v1787_v62 = vpop.xlane.xlu0 %1786 }
 0x70e   : > { %v1789_v63 = vmul.f32 0.00390625, %v1787_v62 }
 0x710   : > { %v3738_v0 = vsub.f32 %v1783_v38, %v1789_v63  ;;  %v3740_v1 = vsub.f32 %v1784_v39, %v1789_v63  ;;  %v3038_v38 = vld [vmem:[%s3545_s1 + $0x3ec] ss:$48 sps:$4 sm:$0xff]   ;;  %v3036_v39 = vld [vmem:[%s3545_s1 + $0x3e8] ss:$48 sps:$4 sm:$0xff]  }
 0x711   : > { %2237 = vmatprep.subr.bf16.mxu1 %v3038_v38 }
 0x712   : > { %v1792_v2 = vmul.f32 %v3738_v0, %v3738_v0  ;;  %v1793_v3 = vmul.f32 %v3740_v1, %v3740_v1  ;;  %2238 = vmatpush1.bf16.msra.mxu1 %v3036_v39 }
 0x713   : > { %2239 = vmatprep.subr.bf16.mxu1 %v3041_v40 }
 0x714   : > { %v1794_v4 = vadd.f32 %v1793_v3, %v1792_v2  ;;  %v3050_v3 = vld [vmem:[%s3545_s1 + $0x56c] ss:$48 sps:$4 sm:$0xff]  }
 0x716   : > { %1795 = vadd.xlane.f32.xlu1 %v1794_v4  ;;  %2240 = vmatpush1.bf16.msra.mxu1 %v3039_v41  ;;  %v3048_v4 = vld [vmem:[%s3545_s1 + $0x568] ss:$48 sps:$4 sm:$0xff]   ;;  %v543_v41 = vld [vmem:[%s3551_s16 + $0x10] sm:$0x3] }
 0x717   : > { %2241 = vmatprep.subr.bf16.mxu1 %v3044_v42  ;;  %v544_v42 = vld [vmem:[%s3551_s16 + $0x12] sm:$0x3] }
 0x71a   : > { %2242 = vmatpush1.bf16.msra.mxu1 %v3042_v43  ;;  %v2280_v43 = vrot.slane %v543_v41, %v3667_v51 }
 0x71b   : > { %2243 = vmatprep.subr.bf16.mxu1 %v3047_v44  ;;  %v2284_v44 = vrot.slane %v543_v41, %v3669_v52 }
 0x71e   : > { %2244 = vmatpush1.bf16.msra.mxu1 %v3045_v45 }
 0x71f   : > { %2245 = vmatprep.subr.bf16.mxu1 %v3050_v3 }
 0x722   : > { %2246 = vmatpush1.bf16.msra.mxu1 %v3048_v4 }
 0x7a3   : > { %v1796_v10 = vpop.xlane.xlu1 %1795 }
 0x7a4   : > { %v1797_v55 = vmul.f32 0.00390625, %v1796_v10  ;;  %v2293_v10 = vrot.slane %v544_v42, %v3667_v51 }
 0x7a6   : > { %v1798_v46 = vadd.f32 1e-05, %v1797_v55  ;;  %v2297_v55 = vrot.slane %v544_v42, %v3669_v52 }
 0x7a8   : > { %3062 = vrsqrt.f32 %v1798_v46 }
 0x7b2   : > { %v3063_v53 = vpop.eup %3062 }
 0x7b3   : > { %v1800_v54 = vmul.f32 %v3063_v53, %v3738_v0  ;;  %v1801_v56 = vmul.f32 %v3063_v53, %v3740_v1  ;;  %v3053_v0 = vld [vmem:[%s3545_s1 + $0x5cc] ss:$48 sps:$4 sm:$0xff]   ;;  %v3051_v1 = vld [vmem:[%s3545_s1 + $0x5c8] ss:$48 sps:$4 sm:$0xff]  }
 0x7b4   : > { %2247 = vmatprep.subr.bf16.mxu1 %v3053_v0 }
 0x7b5   : > { %v1814_v59 = vmul.f32 %v1810_v50, %v1801_v56  ;;  %v1813_v60 = vmul.f32 %v1806_v49, %v1800_v54  ;;  %2248 = vmatpush1.bf16.msra.mxu1 %v3051_v1  ;;  %v2308_v54 = vld [vmem:[#allocation3] sm:$0xff] (!%p2634_p4) }
 0x7b7   : > { %v1827_v61 = vadd.f32 %v1823_v58, %v1814_v59  ;;  %v1826_v62 = vadd.f32 %v1819_v57, %v1813_v60  ;;  %v2309_v57 = vld [vmem:[#allocation3 + $0x8] sm:$0xff] (!%p2634_p4) }
 0x7b9   : > { %v1829_v63 = vpack.c.bf16 %v1827_v61, %v1827_v61  ;;  %v1828_v2 = vpack.c.bf16 %v1826_v62, %v1826_v62 }
 0x7bb   : > { %2033 = vmatprep.mubr.bf16.mxu0 %v1829_v63 }
 0x7bc   : > { %2034 = vmatmul.mubr.bf16.vlgmr.msra.gmra.mrb[12].mxu0 %v1828_v2 }
 0x88f   : > { %v2035_v8 = vpop.f32.mrb[12].mxu0 }
 0x890   : > { %v2036_v9 = vadd.f32 %v2035_v8, %v1834_v6  ;;  %v2037_v11 = vpop.f32.mrb[13].mxu0 }
 0x891   : > { %v2038_v12 = vadd.f32 %v2037_v11, %v1838_v7  ;;  %v2039_v13 = vpop.f32.mrb[14].mxu0 }
 0x892   : > { %v2042_v14 = vmax.f32 %v2036_v9, 0.0  ;;  %v2040_v15 = vpop.f32.mrb[15].mxu0 }
 0x893   : > { %v2043_v16 = vmax.f32 %v2038_v12, 0.0 }
 0x894   : > { %v2044_v18 = vpack.c.bf16 %v2042_v14, %v2042_v14 }
 0x895   : > { %v2045_v17 = vpack.c.bf16 %v2043_v16, %v2043_v16 }
 0x897   : > { %2249 = vmatprep.mubr.bf16.mxu1 %v2045_v17 }
 0x898   : > { %2250 = vmatmul.mubr.bf16.vlgmr.msra.gmra.mrb[16].mxu1 %v2044_v18 }
 0x96b   : > { %v2251_v22 = vpop.f32.mrb[16].mxu1 }
 0x96c   : > { %v2252_v23 = vadd.f32 %v2251_v22, %v2050_v20  ;;  %v2253_v24 = vpop.f32.mrb[17].mxu1 }
 0x96d   : > { %v2254_v25 = vadd.f32 %v2253_v24, %v2054_v21  ;;  %v2255_v26 = vpop.f32.mrb[18].mxu1 }
 0x96e   : > { %v2258_v27 = vadd.f32 %v2252_v23, %v1826_v62  ;;  %v2256_v28 = vpop.f32.mrb[19].mxu1 }
 0x96f   : > { %v2259_v29 = vadd.f32 %v2254_v25, %v1827_v61 }
 0x971   : > { %v2260_v30 = vadd.f32 %v2259_v29, %v2258_v27 }
 0x973   : > { %2261 = vadd.xlane.f32.xlu0 %v2260_v30 }
 0xa00   : > { %v2262_v31 = vpop.xlane.xlu0 %2261 }
 0xa01   : > { %v2263_v32 = vmul.f32 0.00390625, %v2262_v31 }
 0xa03   : > { %v2264_v33 = vsub.f32 %v2258_v27, %v2263_v32  ;;  %v2265_v34 = vsub.f32 %v2259_v29, %v2263_v32 }
 0xa05   : > { %v2266_v35 = vmul.f32 %v2264_v33, %v2264_v33  ;;  %v2267_v36 = vmul.f32 %v2265_v34, %v2265_v34 }
 0xa07   : > { %v2268_v37 = vadd.f32 %v2267_v36, %v2266_v35 }
 0xa09   : > { %2269 = vadd.xlane.f32.xlu1 %v2268_v37 }
 0xa96   : > { %v2270_v38 = vpop.xlane.xlu1 %2269 }
 0xa97   : > { %v2271_v39 = vmul.f32 0.00390625, %v2270_v38 }
 0xa99   : > { %v2272_v40 = vadd.f32 1e-05, %v2271_v39 }
 0xa9b   : > { %3064 = vrsqrt.f32 %v2272_v40 }
 0xaa5   : > { %v3065_v45 = vpop.eup %3064 }
 0xaa6   : > { %v2274_v46 = vmul.f32 %v3065_v45, %v2264_v33  ;;  %v2275_v47 = vmul.f32 %v3065_v45, %v2265_v34  ;;  %2307 = sbr.rel (%p2634_p4) target bundleno = 2743 (0xab7), region = 68 }
 0xaa8   : > { %v2287_v48 = vmul.f32 %v2280_v43, %v2274_v46  ;;  %v2288_v49 = vmul.f32 %v2284_v44, %v2275_v47 }
 0xaaa   : > { %v2300_v50 = vadd.f32 %v2293_v10, %v2287_v48  ;;  %v2301_v53 = vadd.f32 %v2297_v55, %v2288_v49 }
 0xaac   : > { %2302 = vst [vmem:[#allocation2] sm:$0xff] %v2300_v50  ;;  %2303 = vst [vmem:[#allocation2 + $0x8] sm:$0xff] %v2301_v53 }
 0xab3   : > { %v2310_v56 = vld [vmem:[#allocation2] sm:$0xff]  ;;  %v2311_v59 = vld [vmem:[#allocation2 + $0x8] sm:$0xff] }
 0xab4   : > { %v2312_v58 = vadd.f32 %v2310_v56, %v2308_v54  ;;  %v2313_v60 = vadd.f32 %v2311_v59, %v2309_v57 }
 0xab6   : > { %2314 = vst [vmem:[#allocation13] sm:$0xff] %v2312_v58  ;;  %2315 = vst [vmem:[#allocation13 + $0x8] sm:$0xff] %v2313_v60 }
 0xab7 PF: > { %p2717_p2 = scmp.eq.s32.totalorder %s3347_s22, 1  ;;  %s3297_s23 = smov [#allocation13]  }
 0xab8   : > { %s2323_s8 = sshll.u32 %s3297_s23, 4  ;;  %s2324_s8 = int_to_ptr.vmem [resolvable:$true] %s2323_s8 }
 0xab9   : > { %s3210_s25 = scalar_lea.vmem %s2324_s8, 256  ;;  %p3217_p6 = scmp.lt.s32.totalorder %s2324_s8, %s2324_s8 }
 0xaba   : > { %p3211_p12 = scmp.ne.s32.totalorder %s2324_s8, %s3210_s25  ;;  %p3218_p13 = scmp.lt.s32.totalorder %s3210_s25, %s3210_s25 }
 0xabc   : > { %p3212_p1 = pnand %p3211_p12, %p2717_p2  ;;  %p3219_p5 = por %p3218_p13, %p3217_p6 }
 0xabe   : > { %p3213_p8 = pneg %p3212_p1 }
 0xac0   : > { %p3220_p9 = pnand %p3219_p5, %p3213_p8 }
 0xac2   : > { %3223 = shalt.err (!%p3220_p9)
}
 0xac3   : > { %s3224_s10 = scalar_lea.hbm %s3852_s5, 256 }
 0xac4   : > { %p3225_p11 = scmp.ne.s32.totalorder %s3852_s5, %s3224_s10  ;;  %p3230_p10 = scmp.lt.u32.totalorder %s3224_s10, %s3852_s5 }
 0xac6   : > { %p3226_p0 = pnand %p3225_p11, %p2717_p2 }
 0xac8   : > { %p3227_p3 = pneg %p3226_p0 }
 0xaca   : > { %p3232_p7 = pnand %p3230_p10, %p3227_p3 }
 0xacc   : > { %3235 = shalt.err (!%p3232_p7)
}
 0xacd   : > { %2690 = dma.vmem_to_hbm [thread:$0]  (%p2717_p2), %s2324_s8, 256, %s3852_s5, [#allocation6]  }
 0xace   : > { %3265 = dma.done.wait (%p2717_p2), [#allocation6], 256  }
 0xacf   : > { %3267 = vsyncadd (%p2717_p2), [#allocation6], 4294967040 }
 0xad0 PF: > { %s3881_s29 = smov %s3411_s18  ;;  %p18_p4 = scmp.ge.s32.totalorder %s3367_s27, 4  }
 0xad1   : > { %s3882_s18 = smov %s3274_s19  ;;  %s3883_s19 = smov %s3278_s20 }
 0xad2   : > { %s3884_s20 = smov %s3881_s29  ;;  %s3885_s21 = smov %s3367_s27 }
 0xad3   :  { %20 = sbr.rel (!%p18_p4) target bundleno = 8 (0x8), region = 109 }
 0xada   :  { %2336 = vsyncpa [#allocation5], 1 }
 0xadb   :  { %2338 = vsyncpa [#allocation5 + $0x1], 1 }
 0xadc   :  { %2339 = vsyncpa [#allocation8], 1 }
 0xadd   :  { %2340 = vsyncpa [#allocation11], 1 }
 0xade   :  { %2342 = vsyncpa [#allocation11 + $0x1], 1 }
 0xadf   :  { %2343 = vsyncpa [#allocation6], 1 }
 0xae0   :  { %2345 = vsyncpa [#allocation6 + $0x1], 1 }

</bundles_post_ra>
